<compile_context>
chip_gen: v5e
topology: v5e:2x2
jax: 0.10.0
libtpu: 0.0.40
codegen_flags: <defaults>
</compile_context>

<pallas_src>
import functools

import jax
import jax.numpy as jnp
from jax import lax
from jax.experimental import pallas as pl
from jax.experimental.pallas import tpu as pltpu

CONTEXT_SIZE = 64          # context_size in the PyTorch module
N_EMBD = 32 * 6            # n_embd = 192
HEAD_SIZE = 32             # head_size (n_embd // 6, a typical choice)
_LANE = 128                # lane width: each projection padded to a lane boundary


def _num_tensorcores():
    """2 on v7x (two TensorCores per chip), 1 on v5e/v6e, 1 if unknown."""
    try:
        kind = jax.devices()[0].device_kind.lower()
    except Exception:
        return 1
    return 2 if "7" in kind else 1


def _head_kernel(x_ref, w_ref, o_ref, *, use_bf16, head_size):
    # x_ref: (Bblk, T, C); w_ref: (C, 3*pad) lane-padded [k|q|v]; o_ref: (Bblk, T, H)
    bblk, T, C = x_ref.shape
    H = head_size
    pad = w_ref.shape[1] // 3

    compute_dtype = jnp.bfloat16 if use_bf16 else jnp.float32
    prec = None if use_bf16 else lax.Precision.HIGHEST

    # Fused + lane-aligned K/Q/V projection: one MXU matmul for the whole
    # batch block (M = Bblk*T).
    x2 = x_ref[...].reshape(bblk * T, C).astype(compute_dtype)      # (Bblk*T, C)
    kqv = jnp.dot(x2, w_ref[...], preferred_element_type=jnp.float32,
                  precision=prec)                                   # (Bblk*T, 3*pad) f32

    # Each projection starts on a 128-lane boundary -> no in-vreg lane shifts.
    k = kqv[:, 0 * pad:0 * pad + H].reshape(bblk, T, H)
    q = kqv[:, 1 * pad:1 * pad + H].reshape(bblk, T, H)
    v = kqv[:, 2 * pad:2 * pad + H].reshape(bblk, T, H)

    # Fold the C**-0.5 scale into q (T*H elements, not T*T scores).
    q = q * jnp.float32(C ** -0.5)

    # wei[b, t, s] = sum_h k[b,t,h] * q[b,s,h]  == (k @ q^T) per batch element,
    # exactly as the PyTorch module; contraction over H, no explicit transpose.
    wei = lax.dot_general(
        k.astype(compute_dtype), q.astype(compute_dtype),
        dimension_numbers=(((2,), (2,)), ((0,), (0,))),
        preferred_element_type=jnp.float32, precision=prec)         # (Bblk, T, T)

    # Causal mask from two 2-D iotas, broadcast over batch: keep col <= row.
    row = lax.broadcasted_iota(jnp.int32, (T, T), 0)
    col = lax.broadcasted_iota(jnp.int32, (T, T), 1)
    keep = (col <= row)[None, :, :]
    wei = jnp.where(keep, wei, jnp.float32(-jnp.inf))

    # Numerically-stable softmax over the last axis (f32).  The diagonal is
    # always unmasked, so there is never a fully -inf row.
    m = jnp.max(wei, axis=-1, keepdims=True)
    p = jnp.exp(wei - m)
    denom = jnp.sum(p, axis=-1, keepdims=True)
    if use_bf16:
        attn = p * pl.reciprocal(denom, approx=True)   # EUP slot, ~free
    else:
        attn = p / denom                               # exact-f32 path stays exact

    # out[b, t, h] = sum_s attn[b,t,s] * v[b,s,h]
    out = lax.dot_general(
        attn.astype(compute_dtype), v.astype(compute_dtype),
        dimension_numbers=(((2,), (1,)), ((0,), (0,))),
        preferred_element_type=jnp.float32, precision=prec)         # (Bblk, T, H)

    o_ref[...] = out.astype(o_ref.dtype)


def head_forward(x, wk, wq, wv, *, block_b=None, use_bf16=True):
    """x: (B, T, C); wk/wq/wv: (C, H)  ->  (B, T, H) f32."""
    B, T, C = x.shape
    H = wk.shape[1]
    pad = max(_LANE, -(-H // _LANE) * _LANE)

    # Generation-aware grid / block selection:
    #   * v5e / v6e (1 TensorCore): one grid step, M = B*T — fills the MXU M
    #     and pays the ~0.35us/step pipeline overhead exactly once.
    #   * v7x (2 TensorCores): two balanced halves when B is even; otherwise
    #     fall back to one step rather than degrading to tiny-M blocks.
    if block_b is None:
        if _num_tensorcores() >= 2 and B >= 2 and B % 2 == 0:
            block_b = B // 2
        else:
            block_b = B
    assert B % block_b == 0, "block_b must divide B"
    grid_b = B // block_b

    # Fuse the three projection weights into one (C, 3*pad) matrix with each
    # projection starting on a 128-lane boundary (zero-padded columns).
    compute_dtype = jnp.bfloat16 if use_bf16 else jnp.float32
    w = jnp.zeros((C, 3 * pad), compute_dtype)
    w = w.at[:, 0 * pad:0 * pad + H].set(wk.astype(compute_dtype))
    w = w.at[:, 1 * pad:1 * pad + H].set(wq.astype(compute_dtype))
    w = w.at[:, 2 * pad:2 * pad + H].set(wv.astype(compute_dtype))

    cost = pl.CostEstimate(
        flops=B * (2 * T * C * 3 * pad        # fused (padded) K/Q/V projection
                   + 2 * T * T * H            # k @ q^T
                   + 2 * T * T * H),          # attn @ v
        transcendentals=B * T * T,            # exp in softmax
        bytes_accessed=(x.size * x.dtype.itemsize
                        + w.size * w.dtype.itemsize
                        + B * T * H * 4),
    )

    kernel = functools.partial(_head_kernel, use_bf16=use_bf16, head_size=H)

    return pl.pallas_call(
        kernel,
        out_shape=jax.ShapeDtypeStruct((B, T, H), jnp.float32),
        grid_spec=pltpu.PrefetchScalarGridSpec(
            num_scalar_prefetch=0,
            grid=(grid_b,),
            in_specs=[
                pl.BlockSpec((block_b, T, C), lambda b: (b, 0, 0)),
                pl.BlockSpec((C, 3 * pad), lambda b: (0, 0)),
            ],
            out_specs=pl.BlockSpec((block_b, T, H), lambda b: (b, 0, 0)),
        ),
        compiler_params=pltpu.CompilerParams(
            dimension_semantics=("parallel",),
        ),
        cost_estimate=cost,
    )(x, w)


def _reference(x, wk, wq, wv):
    """Plain-JAX high-precision replica of the PyTorch forward."""
    prec = lax.Precision.HIGHEST
    B, T, C = x.shape
    k = jnp.dot(x, wk, precision=prec)
    q = jnp.dot(x, wq, precision=prec)
    v = jnp.dot(x, wv, precision=prec)
    wei = jnp.einsum("bth,bsh->bts", k, q, precision=prec) * (C ** -0.5)
    tril = jnp.tril(jnp.ones((T, T), jnp.float32))
    wei = jnp.where(tril == 0, -jnp.inf, wei)
    wei = jax.nn.softmax(wei, axis=-1)
    return jnp.einsum("bts,bsh->bth", wei, v, precision=prec)


if __name__ == "__main__":
    key = jax.random.PRNGKey(0)
    kx, kk, kq, kv = jax.random.split(key, 4)

    B, T, C, H = 4, CONTEXT_SIZE, N_EMBD, HEAD_SIZE

    # Deterministic synthetic parameters (nn.Linear-style uniform init, no bias).
    bound = 1.0 / float(C) ** 0.5
    wk = jax.random.uniform(kk, (C, H), jnp.float32, -bound, bound)
    wq = jax.random.uniform(kq, (C, H), jnp.float32, -bound, bound)
    wv = jax.random.uniform(kv, (C, H), jnp.float32, -bound, bound)

    x = jax.random.normal(kx, (B, T, C), jnp.float32)

    ref = _reference(x, wk, wq, wv)

    # Default fast path: bf16 MXU operands, f32 accumulation/softmax.
    out = jax.block_until_ready(head_forward(x, wk, wq, wv))
    assert out.shape == (B, T, H)
    max_err = float(jnp.max(jnp.abs(out - ref)))
    assert jnp.allclose(out, ref, atol=2e-2, rtol=2e-2), (
        f"bf16 path mismatch vs reference (max abs err {max_err})")

    # Exact-f32 path must match the reference tightly.
    out_f32 = jax.block_until_ready(head_forward(x, wk, wq, wv, use_bf16=False))
    max_err_f32 = float(jnp.max(jnp.abs(out_f32 - ref)))
    assert jnp.allclose(out_f32, ref, atol=1e-4, rtol=1e-4), (
        f"f32 path mismatch vs reference (max abs err {max_err_f32})")

    print("KERNEL_OK")
</pallas_src>

<mosaic_0001>
module attributes {stable_mosaic.version = 11 : i64} {
  func.func @_head_kernel(%arg0: i32, %arg1: memref<4x64x192xf32, #tpu.memory_space<vmem>>, %arg2: memref<192x384xbf16, #tpu.memory_space<vmem>>, %arg3: memref<4x64x32xf32, #tpu.memory_space<vmem>>) attributes {dimension_semantics = [#tpu.dimension_semantics<parallel>], iteration_bounds = array<i64: 1>, scalar_prefetch = 0 : i64, scratch_operands = 0 : i64, tpu.core_type = #tpu.core_type<tc>, window_params = [{transform_indices = @transform_0, window_bounds = array<i64: 4, 64, 192>}, {pipeline_mode = #tpu.pipeline_mode<synchronous>, transform_indices = @transform_1, window_bounds = array<i64: 192, 384>}, {transform_indices = @transform_2, window_bounds = array<i64: 4, 64, 32>}]} {
    %c0 = arith.constant 0 : index
    %c0_0 = arith.constant 0 : index
    %c0_1 = arith.constant 0 : index
    %0 = vector.load %arg1[%c0, %c0_0, %c0_1] : memref<4x64x192xf32, #tpu.memory_space<vmem>>, vector<4x64x192xf32>
    %1 = vector.shape_cast %0 : vector<4x64x192xf32> to vector<256x192xf32>
    %2 = arith.truncf %1 : vector<256x192xf32> to vector<256x192xbf16>
    %c0_2 = arith.constant 0 : index
    %c0_3 = arith.constant 0 : index
    %3 = vector.load %arg2[%c0_2, %c0_3] : memref<192x384xbf16, #tpu.memory_space<vmem>>, vector<192x384xbf16>
    %cst = arith.constant dense<0.000000e+00> : vector<256x384xf32>
    %4 = tpu.matmul %2, %3, %cst {dimension_numbers = #tpu.dot_dimension_numbers<[1], [0], [0], [1], [0, 0, 1, 1], [], []>} : vector<256x192xbf16>, vector<192x384xbf16>, vector<256x384xf32> -> vector<256x384xf32>
    %5 = vector.extract_strided_slice %4 {offsets = [0, 0], sizes = [256, 32], strides = [1, 1]} : vector<256x384xf32> to vector<256x32xf32>
    %6 = vector.shape_cast %5 : vector<256x32xf32> to vector<4x64x32xf32>
    %7 = vector.extract_strided_slice %4 {offsets = [0, 128], sizes = [256, 32], strides = [1, 1]} : vector<256x384xf32> to vector<256x32xf32>
    %8 = vector.shape_cast %7 : vector<256x32xf32> to vector<4x64x32xf32>
    %9 = vector.extract_strided_slice %4 {offsets = [0, 256], sizes = [256, 32], strides = [1, 1]} : vector<256x384xf32> to vector<256x32xf32>
    %10 = vector.shape_cast %9 : vector<256x32xf32> to vector<4x64x32xf32>
    %cst_4 = arith.constant 0.0721687824 : f32
    %11 = vector.broadcast %cst_4 : f32 to vector<4x64x32xf32>
    %12 = arith.mulf %8, %11 : vector<4x64x32xf32>
    %13 = arith.truncf %6 : vector<4x64x32xf32> to vector<4x64x32xbf16>
    %14 = arith.truncf %12 : vector<4x64x32xf32> to vector<4x64x32xbf16>
    %cst_5 = arith.constant dense<0.000000e+00> : vector<4x64x64xf32>
    %15 = tpu.matmul %13, %14, %cst_5 {dimension_numbers = #tpu.dot_dimension_numbers<[2], [2], [1], [1], [0, 0, 0, 1, 1, 1], [0], [0]>} : vector<4x64x32xbf16>, vector<4x64x32xbf16>, vector<4x64x64xf32> -> vector<4x64x64xf32>
    %16 = tpu.iota {dimensions = array<i32: 0>} : vector<64x64xi32>
    %17 = tpu.iota {dimensions = array<i32: 1>} : vector<64x64xi32>
    %18 = arith.cmpi sle, %17, %16 : vector<64x64xi32>
    %19 = vector.shape_cast %18 : vector<64x64xi1> to vector<1x64x64xi1>
    %cst_6 = arith.constant 0xFF800000 : f32
    %20 = vector.shape_cast %19 : vector<1x64x64xi1> to vector<1x64x64xi1>
    %21 = vector.broadcast %20 : vector<1x64x64xi1> to vector<4x64x64xi1>
    %22 = vector.broadcast %cst_6 : f32 to vector<4x64x64xf32>
    %23 = arith.select %21, %15, %22 : vector<4x64x64xi1>, vector<4x64x64xf32>
    %cst_7 = arith.constant dense<0xFF800000> : vector<4x64xf32>
    %24 = vector.multi_reduction <maximumf>, %23, %cst_7 [2] : vector<4x64x64xf32> to vector<4x64xf32>
    %25 = vector.shape_cast %24 : vector<4x64xf32> to vector<4x64x1xf32>
    %26 = vector.broadcast %25 : vector<4x64x1xf32> to vector<4x64x64xf32>
    %27 = arith.subf %23, %26 : vector<4x64x64xf32>
    %28 = math.exp %27 : vector<4x64x64xf32>
    %cst_8 = arith.constant dense<0.000000e+00> : vector<4x64xf32>
    %29 = vector.multi_reduction <add>, %28, %cst_8 [2] : vector<4x64x64xf32> to vector<4x64xf32>
    %30 = vector.shape_cast %29 : vector<4x64xf32> to vector<4x64x1xf32>
    %31 = tpu.reciprocal %30 {approx = true} : vector<4x64x1xf32> -> vector<4x64x1xf32>
    %32 = vector.broadcast %31 : vector<4x64x1xf32> to vector<4x64x64xf32>
    %33 = arith.mulf %28, %32 : vector<4x64x64xf32>
    %34 = arith.truncf %33 : vector<4x64x64xf32> to vector<4x64x64xbf16>
    %35 = arith.truncf %10 : vector<4x64x32xf32> to vector<4x64x32xbf16>
    %cst_9 = arith.constant dense<0.000000e+00> : vector<4x64x32xf32>
    %36 = tpu.matmul %34, %35, %cst_9 {dimension_numbers = #tpu.dot_dimension_numbers<[2], [1], [1], [2], [0, 0, 0, 1, 1, 2], [0], [0]>} : vector<4x64x64xbf16>, vector<4x64x32xbf16>, vector<4x64x32xf32> -> vector<4x64x32xf32>
    %c0_10 = arith.constant 0 : index
    %c0_11 = arith.constant 0 : index
    %c0_12 = arith.constant 0 : index
    %37 = vector.load %arg3[%c0_10, %c0_11, %c0_12] : memref<4x64x32xf32, #tpu.memory_space<vmem>>, vector<4x64x32xf32>
    tpu.vector_store %arg3[%c0_10, %c0_11, %c0_12], %36 {strides = array<i32>} : memref<4x64x32xf32, #tpu.memory_space<vmem>>, vector<4x64x32xf32>,
    return
  }
  func.func @transform_0(%arg0: i32) -> (i32, i32, i32) {
    %c0_i32 = arith.constant 0 : i32
    %c0_i32_0 = arith.constant 0 : i32
    %c0_i32_1 = arith.constant 0 : i32
    return %arg0, %c0_i32, %c0_i32_0 : i32, i32, i32
  }
  func.func @transform_1(%arg0: i32) -> (i32, i32) {
    %c0_i32 = arith.constant 0 : i32
    %c0_i32_0 = arith.constant 0 : i32
    %c0_i32_1 = arith.constant 0 : i32
    return %c0_i32, %c0_i32_0 : i32, i32
  }
  func.func @transform_2(%arg0: i32) -> (i32, i32, i32) {
    %c0_i32 = arith.constant 0 : i32
    %c0_i32_0 = arith.constant 0 : i32
    %c0_i32_1 = arith.constant 0 : i32
    return %arg0, %c0_i32, %c0_i32_0 : i32, i32, i32
  }
}

</mosaic_0001>

<bundles_post_ra>
// kernel: tpu_custom_call.1
= control target key start
LH: loop header
LB: loop body
LE: loop exit
PB: predicated region body
PF: predicated region fallthrough
CT: control target
= control target key end

     0   :  { %7 = vsyncpa [#allocation3], 0  ;;  %s3894_s0 = inlined_call_operand.hbm [shape: f32[4,64,192], index: 0, kind: input, shape index: {}]   ;;  %s3895_s1 = inlined_call_operand.hbm [shape: bf16[192,384], index: 1, kind: input, shape index: {}]   ;;  %s3896_s2 = inlined_call_operand.vmem [shape: f32[4,64,32], index: 2, kind: output, shape index: {}]  }
   0x1   :  { %s13_s11 = sshll.u32 %s3894_s0, 4  ;;  %s14_s11 = int_to_ptr.hbm [resolvable:$true] %s13_s11 }
   0x2   :  { %8 = vsyncpa [#allocation5], 0  ;;  %s2739_s12 = smov [#allocation2]   ;;  %s26_s16 = sshll.u32 %s3895_s1, 4  ;;  %s27_s16 = int_to_ptr.hbm [resolvable:$true] %s26_s16 }
   0x3   :  { %s15_s13 = sshll.u32 %s2739_s12, 4  ;;  %s2740_s17 = smov 256   ;;  %s16_s13 = int_to_ptr.vmem [resolvable:$true] %s15_s13 }
   0x4   :  { %s2741_s18 = smov 16   ;;  %s2742_s19 = smov [#allocation4]  }
   0x5   :  { %21 = dma.hbm_to_vmem [thread:$0]  %s14_s11, 8192, %s16_s13, [#allocation3], %s2740_s17, %s2740_s17, %s2741_s18  }
   0x6   :  { %s28_s20 = sshll.u32 %s2742_s19, 4  ;;  %s2743_s21 = smov 192   ;;  %s29_s20 = int_to_ptr.vmem [resolvable:$true] %s28_s20 }
   0x7   :  { %s2744_s22 = smov 12  }
   0x8   :  { %34 = dma.hbm_to_vmem [thread:$0]  %s27_s16, 4608, %s29_s20, [#allocation5], %s2743_s21, %s2743_s21, %s2744_s22  }
   0x9   :  { %2735 = dma.done.wait [#allocation3], 8192  }
   0xa   :  { %2736 = vsyncadd [#allocation3], 4294959104 }
   0xb   :  { %2737 = dma.done.wait [#allocation5], 4608  }
   0xc   :  { %2738 = vsyncadd [#allocation5], 4294962688  ;;  %v2379_v0 = vld [vmem:[#allocation4 + $0xa8] sm:$0xf]  ;;  %v2539_v1 = vld [vmem:[#allocation4 + $0xb0] sm:$0xf0] }
   0xd   :  { %v2538_v2 = vld [vmem:[#allocation4 + $0xac] sm:$0xf]  ;;  %v2380_v3 = vor.u32 %v2539_v1, %v2379_v0  ;;  %v2381_v4 = vld [vmem:[#allocation4 + $0xb4] sm:$0xf0]  ;;  %v2367_v5 = vld [vmem:[#allocation4 + $0x90] sm:$0xf] }
   0xe   :  { %v2536_v6 = vld [vmem:[#allocation4 + $0x98] sm:$0xf0]  ;;  %v2384_v7 = vor.u32 %v2538_v2, %v2381_v4  ;;  %v2535_v8 = vld [vmem:[#allocation4 + $0x94] sm:$0xf]  ;;  %v2369_v9 = vld [vmem:[#allocation4 + $0x9c] sm:$0xf0] }
   0xf   :  { %429 = vmatpush.bf16.msra.mxu0 %v2380_v3  ;;  %v2368_v10 = vor.u32 %v2536_v6, %v2367_v5  ;;  %v2355_v11 = vld [vmem:[#allocation4 + $0x78] sm:$0xf]  ;;  %v2372_v12 = vor.u32 %v2535_v8, %v2369_v9  ;;  %v2533_v13 = vld [vmem:[#allocation4 + $0x80] sm:$0xf0]  ;;  %v2550_v14 = vld [vmem:[#allocation4 + $0x10c] sm:$0xf] }
  0x10   :  { %607 = vmatpush.bf16.msra.mxu2 %v2384_v7  ;;  %v2429_v15 = vld [vmem:[#allocation4 + $0x114] sm:$0xf0]  ;;  %v2532_v16 = vld [vmem:[#allocation4 + $0x7c] sm:$0xf]  ;;  %v2357_v17 = vld [vmem:[#allocation4 + $0x84] sm:$0xf0]  ;;  %v2356_v21 = vor.u32 %v2533_v13, %v2355_v11 }
  0x11   :  { %v2432_v18 = vor.u32 %v2550_v14, %v2429_v15  ;;  %v2547_v19 = vld [vmem:[#allocation4 + $0xf4] sm:$0xf]  ;;  %v2417_v20 = vld [vmem:[#allocation4 + $0xfc] sm:$0xf0]  ;;  %v2360_v24 = vor.u32 %v2532_v16, %v2357_v17  ;;  %v2530_v25 = vld [vmem:[#allocation4 + $0x68] sm:$0xf0] }
  0x12   :  { %v2343_v22 = vld [vmem:[#allocation4 + $0x60] sm:$0xf]  ;;  %v2420_v23 = vor.u32 %v2547_v19, %v2417_v20  ;;  %v2544_v26 = vld [vmem:[#allocation4 + $0xdc] sm:$0xf]  ;;  %v2405_v27 = vld [vmem:[#allocation4 + $0xe4] sm:$0xf0] }
  0x13   :  { %430 = vmatpush.bf16.msra.mxu0 %v2368_v10  ;;  %700 = vmatpush.bf16.msra.mxu3 %v2432_v18  ;;  %v2529_v28 = vld [vmem:[#allocation4 + $0x64] sm:$0xf]  ;;  %v2345_v29 = vld [vmem:[#allocation4 + $0x6c] sm:$0xf0]  ;;  %v2344_v30 = vor.u32 %v2530_v25, %v2343_v22  ;;  %v2331_v31 = vld [vmem:[#allocation4 + $0x48] sm:$0xf]  ;;  %v2408_v32 = vor.u32 %v2544_v26, %v2405_v27 }
  0x14   :  { %608 = vmatpush.bf16.msra.mxu2 %v2372_v12  ;;  %v2348_v33 = vor.u32 %v2529_v28, %v2345_v29  ;;  %v2527_v34 = vld [vmem:[#allocation4 + $0x50] sm:$0xf0]  ;;  %v2541_v35 = vld [vmem:[#allocation4 + $0xc4] sm:$0xf]  ;;  %v2393_v36 = vld [vmem:[#allocation4 + $0xcc] sm:$0xf0] }
  0x15   :  { %v2526_v37 = vld [vmem:[#allocation4 + $0x4c] sm:$0xf]  ;;  %v2333_v38 = vld [vmem:[#allocation4 + $0x54] sm:$0xf0]  ;;  %v2332_v39 = vor.u32 %v2527_v34, %v2331_v31  ;;  %v2396_v40 = vor.u32 %v2541_v35, %v2393_v36  ;;  %v2319_v44 = vld [vmem:[#allocation4 + $0x30] sm:$0xf] }
  0x16   :  { %v45_v41 = vld [vmem:[#allocation2 + $0x8] sm:$0xff]  ;;  %v47_v42 = vld [vmem:[#allocation2 + $0x18] sm:$0xff]  ;;  %v2336_v43 = vor.u32 %v2526_v37, %v2333_v38  ;;  %v2523_v46 = vld [vmem:[#allocation4 + $0x34] sm:$0xf]  ;;  %vm380_vm0 = vcmask 523264   ;;  %vm1099_vm1 = vcmask 261120  }
  0x17   :  { %431 = vmatpush.bf16.msra.mxu0 %v2356_v21  ;;  %701 = vmatpush.bf16.msra.mxu3 %v2420_v23  ;;  %v2524_v45 = vld [vmem:[#allocation4 + $0x38] sm:$0xf0]  ;;  %v2321_v47 = vld [vmem:[#allocation4 + $0x3c] sm:$0xf0]  ;;  %v2766_v48 = vpack.c.bf16 %v47_v42, %v45_v41  ;;  %v2307_v51 = vld [vmem:[#allocation4 + $0x18] sm:$0xf] }
  0x18   :  { %609 = vmatpush.bf16.msra.mxu2 %v2360_v24  ;;  %v2320_v49 = vor.u32 %v2524_v45, %v2319_v44  ;;  %v2324_v50 = vor.u32 %v2523_v46, %v2321_v47  ;;  %v2521_v52 = vld [vmem:[#allocation4 + $0x20] sm:$0xf0]  ;;  %v2520_v53 = vld [vmem:[#allocation4 + $0x1c] sm:$0xf]  ;;  %v2309_v54 = vld [vmem:[#allocation4 + $0x24] sm:$0xf0] }
  0x19   :  { %v2427_v55 = vld [vmem:[#allocation4 + $0x108] sm:$0xf]  ;;  %v2551_v56 = vld [vmem:[#allocation4 + $0x110] sm:$0xf0]  ;;  %v2308_v58 = vor.u32 %v2521_v52, %v2307_v51  ;;  %v2312_v59 = vor.u32 %v2520_v53, %v2309_v54  ;;  %v2295_v60 = vld [vmem:[#allocation4] sm:$0xf] }
  0x1a   :  { %v2428_v57 = vor.u32 %v2551_v56, %v2427_v55  ;;  %v2518_v61 = vld [vmem:[#allocation4 + $0x8] sm:$0xf0]  ;;  %v2517_v62 = vld [vmem:[#allocation4 + $0x4] sm:$0xf]  ;;  %v2297_v63 = vld [vmem:[#allocation4 + $0xc] sm:$0xf0] }
  0x1b   :  { %432 = vmatpush.bf16.msra.mxu0 %v2344_v30  ;;  %702 = vmatpush.bf16.msra.mxu3 %v2408_v32  ;;  %v2415_v0 = vld [vmem:[#allocation4 + $0xf0] sm:$0xf]  ;;  %v2548_v1 = vld [vmem:[#allocation4 + $0xf8] sm:$0xf0]  ;;  %v2296_v3 = vor.u32 %v2518_v61, %v2295_v60  ;;  %v44_v4 = vld [vmem:[#allocation2] sm:$0xff]  ;;  %v2300_v6 = vor.u32 %v2517_v62, %v2297_v63 }
  0x1c   :  { %610 = vmatpush.bf16.msra.mxu2 %v2348_v33  ;;  %522 = vmatpush.bf16.msra.mxu1 %v2428_v57  ;;  %v2416_v2 = vor.u32 %v2548_v1, %v2415_v0  ;;  %v46_v5 = vld [vmem:[#allocation2 + $0x10] sm:$0xff]  ;;  %v2403_v7 = vld [vmem:[#allocation4 + $0xd8] sm:$0xf]  ;;  %v2545_v8 = vld [vmem:[#allocation4 + $0xe0] sm:$0xf0] }
  0x1d   :  { %v2770_v9 = vpack.c.bf16 %v46_v5, %v44_v4  ;;  %v2404_v10 = vor.u32 %v2545_v8, %v2403_v7  ;;  %v49_v11 = vld [vmem:[#allocation2 + $0x28] sm:$0xff]  ;;  %v51_v12 = vld [vmem:[#allocation2 + $0x38] sm:$0xff]  ;;  %v2391_v13 = vld [vmem:[#allocation4 + $0xc0] sm:$0xf] }
  0x1e   :  { %v2542_v14 = vld [vmem:[#allocation4 + $0xc8] sm:$0xf0]  ;;  %v2773_v15 = vpack.c.bf16 %v51_v12, %v49_v11  ;;  %v48_v17 = vld [vmem:[#allocation2 + $0x20] sm:$0xff]  ;;  %v50_v18 = vld [vmem:[#allocation2 + $0x30] sm:$0xff] }
  0x1f   :  { %433 = vmatpush.bf16.msra.mxu0 %v2332_v39  ;;  %703 = vmatpush.bf16.msra.mxu3 %v2396_v40  ;;  %v2392_v16 = vor.u32 %v2542_v14, %v2391_v13  ;;  %v2780_v19 = vpack.c.bf16 %v50_v18, %v48_v17  ;;  %v53_v20 = vld [vmem:[#allocation2 + $0x48] sm:$0xff]  ;;  %v55_v21 = vld [vmem:[#allocation2 + $0x58] sm:$0xff]  ;;  %v52_v23 = vld [vmem:[#allocation2 + $0x40] sm:$0xff] }
  0x20   :  { %611 = vmatpush.bf16.msra.mxu2 %v2336_v43  ;;  %523 = vmatpush.bf16.msra.mxu1 %v2416_v2  ;;  %v2783_v22 = vpack.c.bf16 %v55_v21, %v53_v20  ;;  %v54_v24 = vld [vmem:[#allocation2 + $0x50] sm:$0xff]  ;;  %v57_v26 = vld [vmem:[#allocation2 + $0x68] sm:$0xff]  ;;  %v59_v27 = vld [vmem:[#allocation2 + $0x78] sm:$0xff] }
  0x21   :  { %v2790_v25 = vpack.c.bf16 %v54_v24, %v52_v23  ;;  %v2793_v28 = vpack.c.bf16 %v59_v27, %v57_v26  ;;  %v56_v29 = vld [vmem:[#allocation2 + $0x60] sm:$0xff]  ;;  %v58_v30 = vld [vmem:[#allocation2 + $0x70] sm:$0xff]  ;;  %v61_v32 = vld [vmem:[#allocation2 + $0x88] sm:$0xff] }
  0x22   :  { %2453 = vmatmul.msk.bf16.vlgmr.msra.gmra.mxu3 %vm380_vm0, %v2766_v48  ;;  %v2800_v31 = vpack.c.bf16 %v58_v30, %v56_v29  ;;  %v63_v33 = vld [vmem:[#allocation2 + $0x98] sm:$0xff]  ;;  %v60_v35 = vld [vmem:[#allocation2 + $0x80] sm:$0xff]  ;;  %v62_v36 = vld [vmem:[#allocation2 + $0x90] sm:$0xff] }
  0x23   :  { %434 = vmatpush.bf16.msra.mxu0 %v2320_v49  ;;  %v2803_v34 = vpack.c.bf16 %v63_v33, %v61_v32  ;;  %v2810_v37 = vpack.c.bf16 %v62_v36, %v60_v35  ;;  %v65_v38 = vld [vmem:[#allocation2 + $0xa8] sm:$0xff]  ;;  %v67_v39 = vld [vmem:[#allocation2 + $0xb8] sm:$0xff]  ;;  %v64_v41 = vld [vmem:[#allocation2 + $0xa0] sm:$0xff] }
  0x24   :  { %612 = vmatpush.bf16.msra.mxu2 %v2324_v50  ;;  %524 = vmatpush.bf16.msra.mxu1 %v2404_v10  ;;  %v2813_v40 = vpack.c.bf16 %v67_v39, %v65_v38  ;;  %v66_v42 = vld [vmem:[#allocation2 + $0xb0] sm:$0xff]  ;;  %v69_v44 = vld [vmem:[#allocation2 + $0xc8] sm:$0xff]  ;;  %v71_v45 = vld [vmem:[#allocation2 + $0xd8] sm:$0xff] }
  0x25   :  { %v2820_v43 = vpack.c.bf16 %v66_v42, %v64_v41  ;;  %v2823_v46 = vpack.c.bf16 %v71_v45, %v69_v44  ;;  %v68_v47 = vld [vmem:[#allocation2 + $0xc0] sm:$0xff]  ;;  %v70_v49 = vld [vmem:[#allocation2 + $0xd0] sm:$0xff]  ;;  %v73_v51 = vld [vmem:[#allocation2 + $0xe8] sm:$0xff] }
  0x26   :  { %v2830_v50 = vpack.c.bf16 %v70_v49, %v68_v47  ;;  %v75_v52 = vld [vmem:[#allocation2 + $0xf8] sm:$0xff]  ;;  %v72_v54 = vld [vmem:[#allocation2 + $0xe0] sm:$0xff]  ;;  %v74_v55 = vld [vmem:[#allocation2 + $0xf0] sm:$0xff] }
  0x27   :  { %435 = vmatpush.bf16.msra.mxu0 %v2308_v58  ;;  %v2833_v53 = vpack.c.bf16 %v75_v52, %v73_v51  ;;  %v2840_v56 = vpack.c.bf16 %v74_v55, %v72_v54  ;;  %v77_v57 = vld [vmem:[#allocation2 + $0x108] sm:$0xff]  ;;  %v79_v58 = vld [vmem:[#allocation2 + $0x118] sm:$0xff]  ;;  %v76_v61 = vld [vmem:[#allocation2 + $0x100] sm:$0xff] }
  0x28   :  { %613 = vmatpush.bf16.msra.mxu2 %v2312_v59  ;;  %525 = vmatpush.bf16.msra.mxu1 %v2392_v16  ;;  %v2843_v59 = vpack.c.bf16 %v79_v58, %v77_v57  ;;  %v78_v62 = vld [vmem:[#allocation2 + $0x110] sm:$0xff]  ;;  %v81_v1 = vld [vmem:[#allocation2 + $0x128] sm:$0xff]  ;;  %v83_v2 = vld [vmem:[#allocation2 + $0x138] sm:$0xff] }
  0x29   :  { %3914 = vst [vmem:[#allocation8_spill] sm:$0xff] %v2840_v56  ;;  %v2850_v63 = vpack.c.bf16 %v78_v62, %v76_v61  ;;  %v2853_v4 = vpack.c.bf16 %v83_v2, %v81_v1  ;;  %v80_v11 = vld [vmem:[#allocation2 + $0x120] sm:$0xff]  ;;  %v82_v12 = vld [vmem:[#allocation2 + $0x130] sm:$0xff]  ;;  %v85_v24 = vld [vmem:[#allocation2 + $0x148] sm:$0xff] }
  0x2a   :  { %3915 = vst [vmem:[#allocation9_spill] sm:$0xff] %v2843_v59  ;;  %v2862_v20 = vpack.c.bf16 %v82_v12, %v80_v11  ;;  %v87_v26 = vld [vmem:[#allocation2 + $0x158] sm:$0xff]  ;;  %v84_v54 = vld [vmem:[#allocation2 + $0x140] sm:$0xff]  ;;  %v86_v55 = vld [vmem:[#allocation2 + $0x150] sm:$0xff] }
  0x2b   :  { %436 = vmatpush.bf16.msra.mxu0 %v2296_v3  ;;  %2437 = vmatmul.msk.bf16.vlgmr.msra.gmra.mxu1 %vm380_vm0, %v2766_v48  ;;  %3916 = vst [vmem:[#allocation10_spill] sm:$0xff] %v2850_v63  ;;  %v2871_v38 = vpack.c.bf16 %v87_v26, %v85_v24  ;;  %v2890_v62 = vpack.c.bf16 %v86_v55, %v84_v54  ;;  %v89_v1 = vld [vmem:[#allocation2 + $0x168] sm:$0xff]  ;;  %v91_v2 = vld [vmem:[#allocation2 + $0x178] sm:$0xff] }
  0x2c   :  { %614 = vmatpush.bf16.msra.mxu2 %v2300_v6  ;;  %3917 = vst [vmem:[#allocation11_spill] sm:$0xff] %v2853_v4  ;;  %v2897_v11 = vpack.c.bf16 %v91_v2, %v89_v1  ;;  %v97_v12 = vld [vmem:[#allocation2 + $0x1a8] sm:$0xff]  ;;  %v99_v41 = vld [vmem:[#allocation2 + $0x1b8] sm:$0xff] }
  0x2d   :  { %3918 = vst [vmem:[#allocation12_spill] sm:$0xff] %v2862_v20 }
  0x2e   :  { %437 = vmatmul.bf16.vlgmr.msra.gmra.mxu0 %v2770_v9  ;;  %3919 = vst [vmem:[#allocation13_spill] sm:$0xff] %v2871_v38 }
  0x2f   :  { %615 = vmatmul.bf16.vlgmr.msra.gmra.mxu2 %v2770_v9  ;;  %3920 = vst [vmem:[#allocation14_spill] sm:$0xff] %v2890_v62 }
  0x30   :  { %3921 = vst [vmem:[#allocation15_spill] sm:$0xff] %v2897_v11 }
  0x32   :  { %2454 = vmatmul.msk.bf16.gmra.mxu3 %vm380_vm0, %v2773_v15 }
  0x3b   :  { %2438 = vmatmul.msk.bf16.gmra.mxu1 %vm380_vm0, %v2773_v15 }
  0x3e   :  { %442 = vmatmul.bf16.gmra.mxu0 %v2780_v19 }
  0x3f   :  { %620 = vmatmul.bf16.gmra.mxu2 %v2780_v19 }
  0x42   :  { %2455 = vmatmul.msk.bf16.gmra.mxu3 %vm380_vm0, %v2783_v22 }
  0x4b   :  { %2439 = vmatmul.msk.bf16.gmra.mxu1 %vm380_vm0, %v2783_v22 }
  0x4e   :  { %447 = vmatmul.bf16.gmra.mxu0 %v2790_v25 }
  0x4f   :  { %625 = vmatmul.bf16.gmra.mxu2 %v2790_v25 }
  0x52   :  { %2456 = vmatmul.msk.bf16.gmra.mxu3 %vm380_vm0, %v2793_v28 }
  0x5b   :  { %2440 = vmatmul.msk.bf16.gmra.mxu1 %vm380_vm0, %v2793_v28 }
  0x5e   :  { %452 = vmatmul.bf16.gmra.mxu0 %v2800_v31 }
  0x5f   :  { %630 = vmatmul.bf16.gmra.mxu2 %v2800_v31 }
  0x62   :  { %2457 = vmatmul.msk.bf16.gmra.mxu3 %vm380_vm0, %v2803_v34 }
  0x6b   :  { %2441 = vmatmul.msk.bf16.gmra.mxu1 %vm380_vm0, %v2803_v34 }
  0x6e   :  { %457 = vmatmul.bf16.gmra.mxu0 %v2810_v37 }
  0x6f   :  { %635 = vmatmul.bf16.gmra.mxu2 %v2810_v37 }
  0x72   :  { %2458 = vmatmul.msk.bf16.gmra.mxu3 %vm380_vm0, %v2813_v40 }
  0x7b   :  { %2442 = vmatmul.msk.bf16.gmra.mxu1 %vm380_vm0, %v2813_v40 }
  0x7e   :  { %462 = vmatmul.bf16.gmra.mxu0 %v2820_v43 }
  0x7f   :  { %640 = vmatmul.bf16.gmra.mxu2 %v2820_v43 }
  0x82   :  { %2459 = vmatmul.msk.bf16.gmra.mxu3 %vm380_vm0, %v2823_v46 }
  0x8b   :  { %2443 = vmatmul.msk.bf16.gmra.mxu1 %vm380_vm0, %v2823_v46 }
  0x8e   :  { %467 = vmatmul.bf16.gmra.mxu0 %v2830_v50 }
  0x8f   :  { %645 = vmatmul.bf16.gmra.mxu2 %v2830_v50 }
  0x92   :  { %2460 = vmatmul.msk.bf16.gmra.mxu3 %vm380_vm0, %v2833_v53 }
  0x9b   :  { %2444 = vmatmul.msk.bf16.gmra.mxu1 %vm380_vm0, %v2833_v53 }
  0x9e   :  { %472 = vmatmul.bf16.gmra.mxu0 %v2840_v56 }
  0x9f   :  { %650 = vmatmul.bf16.gmra.mxu2 %v2840_v56 }
  0xa2   :  { %2461 = vmatmul.msk.bf16.gmra.mxu3 %vm380_vm0, %v2843_v59 }
  0xa5   :  { %v705_v60 = vpop.f32.mrf.mxu3 }
  0xa8   :  { %v527_v5 = vpop.f32.mrf.mxu1 }
  0xab   :  { %v438_v0 = vpop.f32.mrf.mxu0  ;;  %2445 = vmatmul.msk.bf16.gmra.mxu1 %vm380_vm0, %v2843_v59 }
  0xac   :  { %v528_v16 = vadd.f32 %v527_v5, %v438_v0 }
  0xad   :  { %v707_v3 = vpop.f32.mrf.mxu3 }
  0xae   :  { %477 = vmatmul.bf16.gmra.mxu0 %v2850_v63  ;;  %v995_v27 = vpack.c.bf16 %v528_v16, %v528_v16 }
  0xaf   :  { %655 = vmatmul.bf16.gmra.mxu2 %v2850_v63 }
  0xb0   :  { %v529_v13 = vpop.f32.mrf.mxu1  ;;  %v2866_v35 = vunpack.c.l.b16 %v995_v27 }
  0xb2   :  { %v616_v6 = vpop.f32.mrf.mxu2  ;;  %2462 = vmatmul.msk.bf16.gmra.mxu3 %vm380_vm0, %v2853_v4 }
  0xb3   :  { %v706_v7 = vadd.f32 %v705_v60, %v616_v6  ;;  %v440_v8 = vpop.f32.mrf.mxu0 }
  0xb4   :  { %v530_v17 = vadd.f32 %v529_v13, %v440_v8 }
  0xb5   :  { %v2860_v10 = vpop.f32.mrf.mxu3  ;;  %v963_v14 = vmul.f32 0.07216878, %v706_v7 }
  0xb6   :  { %v996_v29 = vpack.c.bf16 %v530_v17, %v530_v17 }
  0xb7   :  { %v1027_v30 = vpack.c.bf16 %v963_v14, %v963_v14 }
  0xb8   :  { %v2868_v36 = vunpack.c.l.b16 %v996_v29  ;;  %v532_v42 = vpop.f32.mrf.mxu1 }
  0xb9   :  { %v2876_v44 = vunpack.c.l.b16 %v1027_v30 }
  0xba   :  { %v618_v18 = vpop.f32.mrf.mxu2 }
  0xbb   :  { %v708_v21 = vadd.f32 %v707_v3, %v618_v18  ;;  %v443_v23 = vpop.f32.mrf.mxu0  ;;  %2446 = vmatmul.msk.bf16.gmra.mxu1 %vm380_vm0, %v2853_v4  ;;  %v88_v18 = vld [vmem:[#allocation2 + $0x160] sm:$0xff] }
  0xbc   :  { %v533_v58 = vadd.f32 %v532_v42, %v443_v23 }
  0xbd   :  { %v964_v32 = vmul.f32 0.07216878, %v708_v21  ;;  %v2864_v33 = vpop.f32.mrf.mxu3  ;;  %v90_v21 = vld [vmem:[#allocation2 + $0x170] sm:$0xff] }
  0xbe   :  { %482 = vmatmul.bf16.gmra.mxu0 %v2862_v20  ;;  %v997_v3 = vpack.c.bf16 %v533_v58, %v533_v58  ;;  %v2906_v29 = vpack.c.bf16 %v90_v21, %v88_v18 }
  0xbf   :  { %v1028_v39 = vpack.c.bf16 %v964_v32, %v964_v32  ;;  %660 = vmatmul.bf16.gmra.mxu2 %v2862_v20  ;;  %v93_v32 = vld [vmem:[#allocation2 + $0x188] sm:$0xff] }
  0xc0   :  { %v534_v57 = vpop.f32.mrf.mxu1  ;;  %v2892_v7 = vunpack.c.l.b16 %v997_v3  ;;  %3922 = vst [vmem:[#allocation16_spill] sm:$0xff] %v2906_v29 }
  0xc1   :  { %v2878_v45 = vunpack.c.l.b16 %v1028_v39  ;;  %v95_v39 = vld [vmem:[#allocation2 + $0x198] sm:$0xff] }
  0xc2   :  { %v2880_v47 = vpop.f32.mrf.mxu2  ;;  %2463 = vmatmul.msk.bf16.gmra.mxu3 %vm380_vm0, %v2871_v38  ;;  %v2913_v58 = vpack.c.bf16 %v95_v39, %v93_v32 }
  0xc3   :  { %v445_v49 = vpop.f32.mrf.mxu0 }
  0xc4   :  { %v535_v60 = vadd.f32 %v534_v57, %v445_v49  ;;  %3923 = vst [vmem:[#allocation17_spill] sm:$0xff] %v2913_v58 }
  0xc5   :  { %v715_v52 = vpop.f32.mrf.mxu3 }
  0xc6   :  { %v998_v5 = vpack.c.bf16 %v535_v60, %v535_v60 }
  0xc8   :  { %v2894_v8 = vunpack.c.l.b16 %v998_v5  ;;  %v537_v13 = vpop.f32.mrf.mxu1 }
  0xca   :  { %v2888_v61 = vpop.f32.mrf.mxu2 }
  0xcb   :  { %v448_v0 = vpop.f32.mrf.mxu0  ;;  %2447 = vmatmul.msk.bf16.gmra.mxu1 %vm380_vm0, %v2871_v38 }
  0xcc   :  { %v538_v24 = vadd.f32 %v537_v13, %v448_v0  ;;  %v92_v13 = vld [vmem:[#allocation2 + $0x180] sm:$0xff] }
  0xcd   :  { %v717_v6 = vpop.f32.mrf.mxu3 }
  0xce   :  { %487 = vmatmul.bf16.gmra.mxu0 %v2890_v62  ;;  %v999_v42 = vpack.c.bf16 %v538_v24, %v538_v24 }
  0xcf   :  { %665 = vmatmul.bf16.gmra.mxu2 %v2890_v62 }
  0xd0   :  { %v539_v23 = vpop.f32.mrf.mxu1  ;;  %v2908_v55 = vunpack.c.l.b16 %v999_v42 }
  0xd2   :  { %v626_v14 = vpop.f32.mrf.mxu2  ;;  %2464 = vmatmul.msk.bf16.gmra.mxu3 %vm380_vm0, %v2897_v11 }
  0xd3   :  { %v450_v16 = vpop.f32.mrf.mxu0  ;;  %v716_v42 = vadd.f32 %v715_v52, %v626_v14 }
  0xd4   :  { %v540_v26 = vadd.f32 %v539_v23, %v450_v16  ;;  %v94_v16 = vld [vmem:[#allocation2 + $0x190] sm:$0xff] }
  0xd5   :  { %v720_v17 = vpop.f32.mrf.mxu3  ;;  %v2922_v39 = vpack.c.bf16 %v94_v16, %v92_v13  ;;  %v967_v52 = vmul.f32 0.07216878, %v716_v42 }
  0xd6   :  { %v1000_v49 = vpack.c.bf16 %v540_v26, %v540_v26 }
  0xd7   :  { %3924 = vst [vmem:[#allocation18_spill] sm:$0xff] %v2922_v39 }
  0xd8   :  { %v2910_v57 = vunpack.c.l.b16 %v1000_v49  ;;  %v542_v0 = vpop.f32.mrf.mxu1 }
  0xda   :  { %v628_v27 = vpop.f32.mrf.mxu2 }
  0xdb   :  { %v453_v30 = vpop.f32.mrf.mxu0  ;;  %2448 = vmatmul.msk.bf16.gmra.mxu1 %vm380_vm0, %v2897_v11  ;;  %v718_v18 = vadd.f32 %v717_v6, %v628_v27 }
  0xdc   :  { %v543_v24 = vadd.f32 %v542_v0, %v453_v30  ;;  %v2931_v30 = vpack.c.bf16 %v99_v41, %v97_v12  ;;  %v711_v41 = vadd.f32 %v2860_v10, %v2880_v47  ;;  %v1031_v12 = vpack.c.bf16 %v967_v52, %v967_v52  ;;  %v98_v10 = vld [vmem:[#allocation2 + $0x1b0] sm:$0xff] }
  0xdd   :  { %v722_v54 = vpop.f32.mrf.mxu3  ;;  %v968_v11 = vmul.f32 0.07216878, %v718_v18 }
  0xde   :  { %492 = vmatmul.bf16.gmra.mxu0 %v2906_v29  ;;  %v1001_v51 = vpack.c.bf16 %v543_v24, %v543_v24  ;;  %3925 = vst [vmem:[#allocation19_spill] sm:$0xff] %v2931_v30  ;;  %v965_v24 = vmul.f32 0.07216878, %v711_v41 }
  0xdf   :  { %670 = vmatmul.bf16.gmra.mxu2 %v2906_v29 }
  0xe0   :  { %v544_v21 = vpop.f32.mrf.mxu1  ;;  %v2926_v6 = vunpack.c.l.b16 %v1001_v51  ;;  %v1029_v52 = vpack.c.bf16 %v965_v24, %v965_v24 }
  0xe2   :  { %v631_v1 = vpop.f32.mrf.mxu2  ;;  %2465 = vmatmul.msk.bf16.gmra.mxu3 %vm380_vm0, %v2913_v58 }
  0xe3   :  { %v455_v2 = vpop.f32.mrf.mxu0  ;;  %v721_v3 = vadd.f32 %v720_v17, %v631_v1 }
  0xe4   :  { %v545_v26 = vadd.f32 %v544_v21, %v455_v2  ;;  %v713_v2 = vadd.f32 %v2864_v33, %v2888_v61 }
  0xe5   :  { %v725_v5 = vpop.f32.mrf.mxu3  ;;  %v969_v23 = vmul.f32 0.07216878, %v721_v3  ;;  %v1032_v3 = vpack.c.bf16 %v968_v11, %v968_v11 }
  0xe6   :  { %v1002_v29 = vpack.c.bf16 %v545_v26, %v545_v26  ;;  %v966_v33 = vmul.f32 0.07216878, %v713_v2  ;;  %v1091_v26 = vunpack.c.l.b16 %v1031_v12 }
  0xe7   :  { %v1033_v17 = vpack.c.bf16 %v969_v23, %v969_v23  ;;  %v1092_v61 = vunpack.c.l.b16 %v1032_v3  ;;  %v101_v3 = vld [vmem:[#allocation2 + $0x1c8] sm:$0xff] }
  0xe8   :  { %v2928_v27 = vunpack.c.l.b16 %v1002_v29  ;;  %v547_v0 = vpop.f32.mrf.mxu1 }
  0xe9   :  { %v1093_v51 = vunpack.c.l.b16 %v1033_v17  ;;  %v1097_v42 = vpack.c.b16 %v1092_v61, %v1091_v26 }
  0xea   :  { %v633_v32 = vpop.f32.mrf.mxu2 }
  0xeb   :  { %v723_v49 = vadd.f32 %v722_v54, %v633_v32  ;;  %v458_v60 = vpop.f32.mrf.mxu0  ;;  %2449 = vmatmul.msk.bf16.gmra.mxu1 %vm380_vm0, %v2913_v58  ;;  %v96_v32 = vld [vmem:[#allocation2 + $0x1a0] sm:$0xff]  ;;  %v1119_v41 = vsel %vm1099_vm1, %v1097_v42, 0  ;;  %v102_v42 = vld [vmem:[#allocation2 + $0x1d0] sm:$0xff]  ;;  %v3929_v54 = vpack.c.b16 %v2878_v45, %v2876_v44 }
  0xec   :  { %v2951_v2 = vpack.c.bf16 %v98_v10, %v96_v32 }
  0xed   :  { %v970_v1 = vmul.f32 0.07216878, %v723_v49  ;;  %v2924_v62 = vpop.f32.mrf.mxu3  ;;  %v548_v49 = vadd.f32 %v547_v0, %v458_v60  ;;  %v1089_v0 = vunpack.c.l.b16 %v1029_v52 }
  0xee   :  { %497 = vmatmul.bf16.gmra.mxu0 %v2922_v39  ;;  %3926 = vst [vmem:[#allocation20_spill] sm:$0xff] %v2951_v2 }
  0xef   :  { %v1034_v14 = vpack.c.bf16 %v970_v1, %v970_v1  ;;  %675 = vmatmul.bf16.gmra.mxu2 %v2922_v39 }
  0xf0   :  { %v549_v47 = vpop.f32.mrf.mxu1 }
  0xf1   :  { %v1094_v13 = vunpack.c.l.b16 %v1034_v14 }
  0xf2   :  { %v636_v29 = vpop.f32.mrf.mxu2  ;;  %2466 = vmatmul.msk.bf16.gmra.mxu3 %vm380_vm0, %v2931_v30 }
  0xf3   :  { %v2942_v16 = vadd.f32 %v725_v5, %v636_v29  ;;  %v460_v18 = vpop.f32.mrf.mxu0  ;;  %v1098_v21 = vpack.c.b16 %v1094_v13, %v1093_v51  ;;  %v1030_v5 = vpack.c.bf16 %v966_v33, %v966_v33  ;;  %v103_v51 = vld [vmem:[#allocation2 + $0x1d8] sm:$0xff]  ;;  %v1003_v13 = vpack.c.bf16 %v548_v49, %v548_v49 }
  0xf4   :  { %v550_v17 = vadd.f32 %v549_v47, %v460_v18  ;;  %v2960_v60 = vpack.c.bf16 %v103_v51, %v101_v3 }
  0xf5   :  { %v1122_v11 = vsel %vm1099_vm1, %v1098_v21, 0  ;;  %v2947_v23 = vpop.f32.mrf.mxu3  ;;  %v1090_v21 = vunpack.c.l.b16 %v1030_v5  ;;  %v100_v5 = vld [vmem:[#allocation2 + $0x1c0] sm:$0xff] }
  0xf6   :  { %1128 = vmatpush.bf16.xpose.msrb.mxu0 %v1122_v11  ;;  %v1004_v29 = vpack.c.bf16 %v550_v17, %v550_v17  ;;  %v2956_v11 = vunpack.c.l.b16 %v1003_v13  ;;  %3927 = vst [vmem:[#allocation21_spill] sm:$0xff] %v2960_v60  ;;  %v2975_v13 = vpack.c.bf16 %v102_v42, %v100_v5  ;;  %v106_v42 = vld [vmem:[#allocation2 + $0x1f0] sm:$0xff] }
  0xf7   :  { %v1096_v24 = vpack.c.b16 %v1090_v21, %v1089_v0  ;;  %v107_v21 = vld [vmem:[#allocation2 + $0x1f8] sm:$0xff] }
  0xf8   :  { %v2958_v33 = vunpack.c.l.b16 %v1004_v29  ;;  %v552_v61 = vpop.f32.mrf.mxu1  ;;  %3928 = vst [vmem:[#allocation22_spill] sm:$0xff] %v2975_v13  ;;  %v105_v29 = vld [vmem:[#allocation2 + $0x1e8] sm:$0xff] }
  0xf9   :  { %v1116_v10 = vsel %vm1099_vm1, %v1096_v24, 0  ;;  %v1113_v24 = vsel %vm1099_vm1, %v3929_v54, 0  ;;  %v104_v54 = vld [vmem:[#allocation2 + $0x1e0] sm:$0xff] }
  0xfa   :  { %v2949_v1 = vpop.f32.mrf.mxu2 }
  0xfb   :  { %v463_v14 = vpop.f32.mrf.mxu0  ;;  %2450 = vmatmul.msk.bf16.gmra.mxu1 %vm380_vm0, %v2931_v30 }
  0xfc   :  { %v553_v17 = vadd.f32 %v552_v61, %v463_v14  ;;  %v2985_v14 = vpack.c.bf16 %v107_v21, %v105_v29 }
  0xfd   :  { %v2954_v12 = vpop.f32.mrf.mxu3 }
  0xfe   :  { %1129 = vmatpush.bf16.xpose.msrb.mxu0 %v1119_v41  ;;  %v1005_v41 = vpack.c.bf16 %v553_v17, %v553_v17  ;;  %3930 = vst [vmem:[#allocation23_spill] sm:$0xff] %v2985_v14 }
  0xff   :  { %502 = vmatmul.bf16.gmra.mxu0 %v2951_v2  ;;  %680 = vmatmul.bf16.gmra.mxu2 %v2951_v2 }
 0x100   :  { %v554_v49 = vpop.f32.mrf.mxu1  ;;  %v2981_v18 = vunpack.c.l.b16 %v1005_v41  ;;  %v2995_v41 = vpack.c.bf16 %v106_v42, %v104_v54 }
 0x102   :  { %v2966_v26 = vpop.f32.mrf.mxu2  ;;  %2467 = vmatmul.msk.bf16.gmra.mxu3 %vm380_vm0, %v2960_v60  ;;  %3931 = vst [vmem:[#allocation24_spill] sm:$0xff] %v2995_v41 }
 0x103   :  { %v465_v32 = vpop.f32.mrf.mxu0 }
 0x104   :  { %v555_v52 = vadd.f32 %v554_v49, %v465_v32 }
 0x105   :  { %v735_v47 = vpop.f32.mrf.mxu3 }
 0x106   :  { %1130 = vmatpush.bf16.xpose.msrb.mxu0 %v1116_v10  ;;  %v1006_v0 = vpack.c.bf16 %v555_v52, %v555_v52 }
 0x108   :  { %v2983_v2 = vunpack.c.l.b16 %v1006_v0  ;;  %v557_v32 = vpop.f32.mrf.mxu1 }
 0x10a   :  { %v2973_v3 = vpop.f32.mrf.mxu2 }
 0x10b   :  { %v468_v51 = vpop.f32.mrf.mxu0  ;;  %2451 = vmatmul.msk.bf16.gmra.mxu1 %vm380_vm0, %v2960_v60 }
 0x10c   :  { %v558_v17 = vadd.f32 %v557_v32, %v468_v51 }
 0x10d   :  { %v737_v10 = vpop.f32.mrf.mxu3 }
 0x10e   :  { %1131 = vmatpush.bf16.xpose.msrb.mxu0 %v1113_v24  ;;  %v1007_v0 = vpack.c.bf16 %v558_v17, %v558_v17 }
 0x10f   :  { %507 = vmatmul.bf16.gmra.mxu0 %v2975_v13  ;;  %685 = vmatmul.bf16.gmra.mxu2 %v2975_v13 }
 0x110   :  { %v559_v49 = vpop.f32.mrf.mxu1  ;;  %v2997_v13 = vunpack.c.l.b16 %v1007_v0 }
 0x112   :  { %v646_v5 = vpop.f32.mrf.mxu2  ;;  %2468 = vmatmul.msk.bf16.gmra.mxu3 %vm380_vm0, %v2985_v14 }
 0x113   :  { %v470_v44 = vpop.f32.mrf.mxu0  ;;  %v736_v58 = vadd.f32 %v735_v47, %v646_v5  ;;  %v733_v47 = vadd.f32 %v2954_v12, %v2973_v3  ;;  %v728_v12 = vadd.f32 %v2924_v62, %v2949_v1 }
 0x114   :  { %v560_v52 = vadd.f32 %v559_v49, %v470_v44 }
 0x115   :  { %v740_v45 = vpop.f32.mrf.mxu3 }
 0x116   :  { %v1008_v24 = vpack.c.bf16 %v560_v52, %v560_v52 }
 0x118   :  { %v2999_v30 = vunpack.c.l.b16 %v1008_v24  ;;  %v562_v51 = vpop.f32.mrf.mxu1 }
 0x11a   :  { %v648_v29 = vpop.f32.mrf.mxu2 }
 0x11b   :  { %v473_v21 = vpop.f32.mrf.mxu0  ;;  %2452 = vmatmul.msk.bf16.gmra.mxu1 %vm380_vm0, %v2985_v14  ;;  %v738_v49 = vadd.f32 %v737_v10, %v648_v29  ;;  %v975_v10 = vmul.f32 0.07216878, %v736_v58 }
 0x11c   :  { %v563_v0 = vadd.f32 %v562_v51, %v473_v21  ;;  %v3932_v21 = vpack.c.b16 %v2868_v36, %v2866_v35  ;;  %v974_v36 = vmul.f32 0.07216878, %v733_v47 }
 0x11d   :  { %v742_v61 = vpop.f32.mrf.mxu3  ;;  %v976_v4 = vmul.f32 0.07216878, %v738_v49  ;;  %v1039_v58 = vpack.c.bf16 %v975_v10, %v975_v10  ;;  %v971_v10 = vmul.f32 0.07216878, %v2942_v16 }
 0x11e   :  { %v1009_v20 = vpack.c.bf16 %v563_v0, %v563_v0  ;;  %v1038_v3 = vpack.c.bf16 %v974_v36, %v974_v36 }
 0x11f   :  { %512 = vmatmul.bf16.gmra.mxu0 %v2995_v41  ;;  %690 = vmatmul.bf16.gmra.mxu2 %v2995_v41 }
 0x120   :  { %v564_v17 = vpop.f32.mrf.mxu1  ;;  %v3011_v14 = vunpack.c.l.b16 %v1009_v20 }
 0x122   :  { %v651_v32 = vpop.f32.mrf.mxu2 }
 0x123   :  { %v475_v44 = vpop.f32.mrf.mxu0  ;;  %v741_v54 = vadd.f32 %v740_v45, %v651_v32 }
 0x124   :  { %v565_v24 = vadd.f32 %v564_v17, %v475_v44 }
 0x125   :  { %v745_v42 = vpop.f32.mrf.mxu3  ;;  %v977_v52 = vmul.f32 0.07216878, %v741_v54 }
 0x126   :  { %v1010_v60 = vpack.c.bf16 %v565_v24, %v565_v24 }
 0x127   :  { %v1041_v63 = vpack.c.bf16 %v977_v52, %v977_v52  ;;  %v1184_v52 = vunpack.c.l.b16 %v1038_v3 }
 0x128   :  { %v3013_v45 = vunpack.c.l.b16 %v1010_v60  ;;  %v731_v60 = vadd.f32 %v2947_v23, %v2966_v26 }
 0x12a   :  { %v653_v39 = vpop.f32.mrf.mxu2 }
 0x12b   :  { %v743_v38 = vadd.f32 %v742_v61, %v653_v39  ;;  %v3007_v41 = vpop.f32.mrf.mxu0  ;;  %v1172_v39 = vpack.c.b16 %v3013_v45, %v3011_v14  ;;  %v1187_v61 = vunpack.c.l.b16 %v1041_v63  ;;  %v1185_v63 = vunpack.c.l.b16 %v1039_v58 }
 0x12d   :  { %v978_v59 = vmul.f32 0.07216878, %v743_v38  ;;  %v3009_v56 = vpop.f32.mrf.mxu3  ;;  %v1040_v38 = vpack.c.bf16 %v976_v4, %v976_v4  ;;  %v973_v4 = vmul.f32 0.07216878, %v731_v60 }
 0x12f   :  { %v1042_v29 = vpack.c.bf16 %v978_v59, %v978_v59  ;;  %2485 = vmatmul.msk.bf16.vlgmr.msrb.gmra.mxu0 %vm1099_vm1, %v3932_v21  ;;  %v1186_v32 = vunpack.c.l.b16 %v1040_v38  ;;  %v1037_v49 = vpack.c.bf16 %v973_v4, %v973_v4  ;;  %v3933_v21 = vpack.c.b16 %v2894_v8, %v2892_v7 }
 0x130   :  { %v1035_v38 = vpack.c.bf16 %v971_v10, %v971_v10 }
 0x131   :  { %v1188_v5 = vunpack.c.l.b16 %v1042_v29  ;;  %v1191_v23 = vpack.c.b16 %v1186_v32, %v1185_v63  ;;  %v1183_v29 = vunpack.c.l.b16 %v1037_v49  ;;  %v3934_v32 = vpack.c.b16 %v2910_v57, %v2908_v55 }
 0x132   :  { %v656_v20 = vpop.f32.mrf.mxu2  ;;  %v1181_v58 = vunpack.c.l.b16 %v1035_v38  ;;  %v3935_v63 = vpack.c.b16 %v2958_v33, %v2956_v11  ;;  %v3936_v55 = vpack.c.b16 %v2928_v27, %v2926_v6  ;;  %v3937_v11 = vpack.c.b16 %v2983_v2, %v2981_v18 }
 0x133   :  { %v3025_v59 = vpop.f32.mrf.mxu0  ;;  %v1192_v51 = vpack.c.b16 %v1188_v5, %v1187_v61  ;;  %v3027_v35 = vadd.f32 %v745_v42, %v656_v20  ;;  %v972_v42 = vmul.f32 0.07216878, %v728_v12  ;;  %v1212_v0 = vsel %vm1099_vm1, %v1191_v23, 0 }
 0x134   :  { %v1190_v1 = vpack.c.b16 %v1184_v52, %v1183_v29 }
 0x135   :  { %v1215_v44 = vsel %vm1099_vm1, %v1192_v51, 0  ;;  %v3030_v54 = vpop.f32.mrf.mxu3  ;;  %v1036_v62 = vpack.c.bf16 %v972_v42, %v972_v42  ;;  %v3062_v42 = vpop.f32.mrf.mxu1 }
 0x136   :  { %1221 = vmatpush.bf16.xpose.msrb.mxu2 %v1215_v44  ;;  %v1209_v20 = vsel %vm1099_vm1, %v1190_v1, 0 }
 0x137   :  { %v1182_v5 = vunpack.c.l.b16 %v1036_v62 }
 0x139   :  { %v1189_v51 = vpack.c.b16 %v1182_v5, %v1181_v58 }
 0x13a   :  { %v3034_v26 = vpop.f32.mrf.mxu2 }
 0x13b   :  { %v3036_v17 = vpop.f32.mrf.mxu0  ;;  %v1206_v7 = vsel %vm1099_vm1, %v1189_v51, 0 }
 0x13d   :  { %v752_v24 = vpop.f32.mrf.mxu3  ;;  %v569_v62 = vpop.f32.mrf.mxu1 }
 0x13e   :  { %1222 = vmatpush.bf16.xpose.msrb.mxu2 %v1212_v0 }
 0x13f   :  { %2486 = vmatmul.msk.bf16.gmra.mxu0 %vm1099_vm1, %v3933_v21 }
 0x142   :  { %v661_v47 = vpop.f32.mrf.mxu2 }
 0x143   :  { %v3044_v61 = vpop.f32.mrf.mxu0 }
 0x145   :  { %v755_v60 = vpop.f32.mrf.mxu3 }
 0x146   :  { %1223 = vmatpush.bf16.xpose.msrb.mxu2 %v1209_v20 }
 0x14a   :  { %v663_v16 = vpop.f32.mrf.mxu2 }
 0x14b   :  { %v3047_v36 = vpop.f32.mrf.mxu0 }
 0x14d   :  { %v757_v8 = vpop.f32.mrf.mxu3 }
 0x14e   :  { %1224 = vmatpush.bf16.xpose.msrb.mxu2 %v1206_v7 }
 0x14f   :  { %2487 = vmatmul.msk.bf16.gmra.mxu0 %vm1099_vm1, %v3934_v32 }
 0x152   :  { %v666_v44 = vpop.f32.mrf.mxu2 }
 0x153   :  { %v3054_v4 = vpop.f32.mrf.mxu0  ;;  %v756_v10 = vadd.f32 %v755_v60, %v666_v44  ;;  %v753_v60 = vadd.f32 %v752_v24, %v663_v16  ;;  %v748_v16 = vadd.f32 %v3009_v56, %v3034_v26 }
 0x155   :  { %2489 = vmatmul.msk.bf16.vlgmr.msrb.gmra.mxu2 %vm1099_vm1, %v3935_v63  ;;  %v760_v12 = vpop.f32.mrf.mxu3  ;;  %v983_v38 = vmul.f32 0.07216878, %v756_v10  ;;  %v751_v63 = vadd.f32 %v3030_v54, %v661_v47  ;;  %v982_v10 = vmul.f32 0.07216878, %v753_v60 }
 0x157   :  { %v1047_v7 = vpack.c.bf16 %v983_v38, %v983_v38 }
 0x15a   :  { %v668_v3 = vpop.f32.mrf.mxu2 }
 0x15b   :  { %v3060_v23 = vpop.f32.mrf.mxu0  ;;  %v758_v29 = vadd.f32 %v757_v8, %v668_v3  ;;  %v1278_v3 = vunpack.c.l.b16 %v1047_v7 }
 0x15d   :  { %v762_v49 = vpop.f32.mrf.mxu3  ;;  %v984_v5 = vmul.f32 0.07216878, %v758_v29  ;;  %v3938_v29 = vpack.c.b16 %v2999_v30, %v2997_v13  ;;  %v979_v13 = vmul.f32 0.07216878, %v3027_v35 }
 0x15f   :  { %2488 = vmatmul.msk.bf16.gmra.mxu0 %vm1099_vm1, %v3936_v55  ;;  %v1048_v32 = vpack.c.bf16 %v984_v5, %v984_v5 }
 0x161   :  { %v1279_v55 = vunpack.c.l.b16 %v1048_v32  ;;  %v1043_v32 = vpack.c.bf16 %v979_v13, %v979_v13 }
 0x162   :  { %v671_v57 = vpop.f32.mrf.mxu2 }
 0x163   :  { %v3068_v52 = vpop.f32.mrf.mxu0  ;;  %v761_v0 = vadd.f32 %v760_v12, %v671_v57  ;;  %v572_v12 = vpop.f32.mrf.mxu1  ;;  %v1284_v47 = vpack.c.b16 %v1279_v55, %v1278_v3  ;;  %v570_v3 = vadd.f32 %v569_v62, %v3025_v59 }
 0x164   :  { %v573_v59 = vadd.f32 %v572_v12, %v3036_v17 }
 0x165   :  { %2490 = vmatmul.msk.bf16.gmra.mxu2 %vm1099_vm1, %v3937_v11  ;;  %v765_v33 = vpop.f32.mrf.mxu3  ;;  %v985_v21 = vmul.f32 0.07216878, %v761_v0  ;;  %v1305_v38 = vsel %vm1099_vm1, %v1284_v47, 0 }
 0x166   :  { %v1013_v13 = vpack.c.bf16 %v573_v59, %v573_v59 }
 0x167   :  { %v1049_v6 = vpack.c.bf16 %v985_v21, %v985_v21 }
 0x169   :  { %v1280_v2 = vunpack.c.l.b16 %v1049_v6  ;;  %v980_v6 = vmul.f32 0.07216878, %v748_v16 }
 0x16a   :  { %v673_v1 = vpop.f32.mrf.mxu2 }
 0x16b   :  { %v3074_v27 = vpop.f32.mrf.mxu0  ;;  %v763_v20 = vadd.f32 %v762_v49, %v673_v1  ;;  %v981_v49 = vmul.f32 0.07216878, %v751_v63  ;;  %v1046_v1 = vpack.c.bf16 %v982_v10, %v982_v10  ;;  %v574_v30 = vpop.f32.mrf.mxu1  ;;  %v1274_v63 = vunpack.c.l.b16 %v1043_v32 }
 0x16c   :  { %v1256_v32 = vunpack.c.l.b16 %v1013_v13 }
 0x16d   :  { %v986_v58 = vmul.f32 0.07216878, %v763_v20  ;;  %v3076_v51 = vpop.f32.mrf.mxu3  ;;  %v1045_v21 = vpack.c.bf16 %v981_v49, %v981_v49 }
 0x16f   :  { %v1050_v18 = vpack.c.bf16 %v986_v58, %v986_v58  ;;  %v1276_v20 = vunpack.c.l.b16 %v1045_v21  ;;  %v1277_v58 = vunpack.c.l.b16 %v1046_v1 }
 0x171   :  { %v1281_v8 = vunpack.c.l.b16 %v1050_v18  ;;  %v1283_v56 = vpack.c.b16 %v1277_v58, %v1276_v20 }
 0x172   :  { %v676_v44 = vpop.f32.mrf.mxu2 }
 0x173   :  { %v1285_v57 = vpack.c.b16 %v1281_v8, %v1280_v2  ;;  %v3079_v0 = vpop.f32.mrf.mxu0  ;;  %v3081_v11 = vadd.f32 %v765_v33, %v676_v44  ;;  %v1044_v2 = vpack.c.bf16 %v980_v6, %v980_v6  ;;  %v1302_v35 = vsel %vm1099_vm1, %v1283_v56, 0  ;;  %v577_v8 = vpop.f32.mrf.mxu1 }
 0x174   :  { %v568_v44 = vadd.f32 %v3062_v42, %v3007_v41  ;;  %v575_v42 = vadd.f32 %v574_v30, %v3044_v61 }
 0x175   :  { %2491 = vmatmul.msk.bf16.gmra.mxu2 %vm1099_vm1, %v3938_v29  ;;  %v1308_v54 = vsel %vm1099_vm1, %v1285_v57, 0  ;;  %v3088_v24 = vpop.f32.mrf.mxu3  ;;  %v1275_v60 = vunpack.c.l.b16 %v1044_v2  ;;  %v1012_v29 = vpack.c.bf16 %v570_v3, %v570_v3 }
 0x176   :  { %1314 = vmatpush.bf16.xpose.msra.mxu0 %v1308_v54  ;;  %v1011_v10 = vpack.c.bf16 %v568_v44, %v568_v44  ;;  %v1014_v6 = vpack.c.bf16 %v575_v42, %v575_v42 }
 0x177   :  { %v1282_v55 = vpack.c.b16 %v1275_v60, %v1274_v63  ;;  %v1432_v63 = vlaneseq }
 0x178   :  { %v1254_v45 = vunpack.c.l.b16 %v1011_v10  ;;  %v1257_v2 = vunpack.c.l.b16 %v1014_v6  ;;  %v578_v10 = vadd.f32 %v577_v8, %v3047_v36  ;;  %v2375_v6 = vld [vmem:[#allocation4 + $0x98] sm:$0xf] }
 0x179   :  { %v1299_v14 = vsel %vm1099_vm1, %v1282_v55, 0  ;;  %v3131_v12 = vshrl.u32 %v1432_v63, 7  ;;  %v3133_v30 = vand.u32 127, %v1432_v63 }
 0x17a   :  { %v3092_v33 = vpop.f32.mrf.mxu2  ;;  %v1263_v60 = vpack.c.b16 %v1257_v2, %v1256_v32 }
 0x17b   :  { %v579_v47 = vpop.f32.mrf.mxu1  ;;  %vm1443_vm2 = vcmp.le.s32.totalorder %v3133_v30, %v3131_v12  ;;  %v3147_v63 = vadd.s32 8, %v3131_v12 }
 0x17c   :  { %v3095_v5 = vpop.f32.mrf.mxu0 }
 0x17d   :  { %v3098_v7 = vpop.f32.mrf.mxu3  ;;  %vm1444_vm3 = vcmp.le.s32.totalorder %v3133_v30, %v3147_v63 }
 0x17e   :  { %1315 = vmatpush.bf16.xpose.msra.mxu0 %v1305_v38 }
 0x182   :  { %v3100_v26 = vpop.f32.mrf.mxu2 }
 0x183   :  { %v3122_v38 = vpop.f32.mrf.mxu1 }
 0x184   :  { %v3102_v18 = vpop.f32.mrf.mxu0 }
 0x185   :  { %2492 = vmatmul.msk.bf16.gmra.mxu2 %vm1099_vm1, %v1172_v39  ;;  %v775_v49 = vpop.f32.mrf.mxu3  ;;  %v1255_v39 = vunpack.c.l.b16 %v1012_v29  ;;  %v580_v29 = vadd.f32 %v579_v47, %v3054_v4 }
 0x186   :  { %1316 = vmatpush.bf16.xpose.msra.mxu0 %v1302_v35 }
 0x187   :  { %v1262_v21 = vpack.c.b16 %v1255_v39, %v1254_v45  ;;  %v2540_v45 = vld [vmem:[#allocation4 + $0xb8] sm:$0xf0]  ;;  %v1016_v13 = vpack.c.bf16 %v580_v29, %v580_v29  ;;  %v2534_v29 = vld [vmem:[#allocation4 + $0x88] sm:$0xf0] }
 0x18a   :  { %v3112_v57 = vpop.f32.mrf.mxu2 }
 0x18b   :  { %v3128_v3 = vpop.f32.mrf.mxu1 }
 0x18c   :  { %v3114_v54 = vpop.f32.mrf.mxu0 }
 0x18d   :  { %v777_v41 = vpop.f32.mrf.mxu3 }
 0x18e   :  { %1317 = vmatpush.bf16.xpose.msra.mxu0 %v1299_v14  ;;  %v2387_v14 = vld [vmem:[#allocation4 + $0xb0] sm:$0xf] }
 0x192   :  { %v686_v16 = vpop.f32.mrf.mxu2 }
 0x193   :  { %v776_v17 = vadd.f32 %v775_v49, %v686_v16 }
 0x194   :  { %v3117_v1 = vpop.f32.mrf.mxu0 }
 0x195   :  { %2493 = vmatmul.msk.bf16.vlgmr.msra.gmra.mxu0 %vm1099_vm1, %v1262_v21  ;;  %v780_v58 = vpop.f32.mrf.mxu3  ;;  %v2388_v21 = vor.u32 %v2540_v45, %v2387_v14  ;;  %v991_v59 = vmul.f32 0.07216878, %v776_v17  ;;  %v2435_v14 = vld [vmem:[#allocation4 + $0x110] sm:$0xf] }
 0x197   :  { %785 = vmatpush.bf16.msrb.mxu1 %v2388_v21  ;;  %v1055_v32 = vpack.c.bf16 %v991_v59, %v991_v59  ;;  %v2351_v21 = vld [vmem:[#allocation4 + $0x68] sm:$0xf]  ;;  %v2531_v59 = vld [vmem:[#allocation4 + $0x70] sm:$0xf0] }
 0x19a   :  { %v688_v62 = vpop.f32.mrf.mxu2 }
 0x19b   :  { %v778_v61 = vadd.f32 %v777_v41, %v688_v62  ;;  %v1015_v41 = vpack.c.bf16 %v578_v10, %v578_v10  ;;  %v2363_v10 = vld [vmem:[#allocation4 + $0x80] sm:$0xf] }
 0x19c   :  { %v3124_v20 = vpop.f32.mrf.mxu0  ;;  %v2364_v45 = vor.u32 %v2534_v29, %v2363_v10 }
 0x19d   :  { %v782_v39 = vpop.f32.mrf.mxu3  ;;  %v992_v42 = vmul.f32 0.07216878, %v778_v61  ;;  %v1258_v17 = vunpack.c.l.b16 %v1015_v41  ;;  %v2549_v41 = vld [vmem:[#allocation4 + $0x100] sm:$0xf0] }
 0x19f   :  { %v1056_v2 = vpack.c.bf16 %v992_v42, %v992_v42  ;;  %v771_v42 = vadd.f32 %v3088_v24, %v3100_v26 }
 0x1a1   :  { %v989_v24 = vmul.f32 0.07216878, %v771_v42  ;;  %v2546_v42 = vld [vmem:[#allocation4 + $0xe8] sm:$0xf0] }
 0x1a2   :  { %v691_v56 = vpop.f32.mrf.mxu2 }
 0x1a3   :  { %v781_v35 = vadd.f32 %v780_v58, %v691_v56  ;;  %v2537_v58 = vld [vmem:[#allocation4 + $0xa0] sm:$0xf0] }
 0x1a4   :  { %v3126_v44 = vpop.f32.mrf.mxu0  ;;  %v2376_v8 = vor.u32 %v2537_v58, %v2375_v6  ;;  %v1371_v58 = vunpack.c.l.b16 %v1055_v32 }
 0x1a5   :  { %2494 = vmatmul.msk.bf16.gmra.mxu0 %vm1099_vm1, %v1263_v60  ;;  %v993_v55 = vmul.f32 0.07216878, %v781_v35  ;;  %v3149_v60 = vpop.f32.mrf.mxu1 }
 0x1a6   :  { %786 = vmatpush.bf16.msrb.mxu1 %v2376_v8 }
 0x1a7   :  { %v1057_v16 = vpack.c.bf16 %v993_v55, %v993_v55  ;;  %v1259_v55 = vunpack.c.l.b16 %v1016_v13  ;;  %v2352_v13 = vor.u32 %v2531_v59, %v2351_v21  ;;  %v2411_v59 = vld [vmem:[#allocation4 + $0xe0] sm:$0xf] }
 0x1a9   :  { %v1373_v35 = vunpack.c.l.b16 %v1057_v16  ;;  %v2423_v16 = vld [vmem:[#allocation4 + $0xf8] sm:$0xf] }
 0x1aa   :  { %v693_v49 = vpop.f32.mrf.mxu2  ;;  %787 = vmatpush.bf16.msrb.mxu1 %v2364_v45  ;;  %v768_v45 = vadd.f32 %v3076_v51, %v3092_v33  ;;  %v2543_v51 = vld [vmem:[#allocation4 + $0xd0] sm:$0xf0] }
 0x1ab   :  { %v783_v62 = vadd.f32 %v782_v39, %v693_v49  ;;  %v2552_v39 = vld [vmem:[#allocation4 + $0x118] sm:$0xf0]  ;;  %v773_v49 = vadd.f32 %v3098_v7, %v3112_v57 }
 0x1ac   :  { %v1133_v36 = vpop.f32.mrf.mxu0  ;;  %v2436_v6 = vor.u32 %v2552_v39, %v2435_v14  ;;  %v1053_v39 = vpack.c.bf16 %v989_v24, %v989_v24  ;;  %v988_v33 = vmul.f32 0.07216878, %v768_v45  ;;  %v2315_v24 = vld [vmem:[#allocation4 + $0x20] sm:$0xf] }
 0x1ad   :  { %v3142_v4 = vsel %vm1443_vm2, %v1133_v36, -inf  ;;  %v994_v47 = vmul.f32 0.07216878, %v783_v62  ;;  %v1372_v36 = vunpack.c.l.b16 %v1056_v2  ;;  %v990_v26 = vmul.f32 0.07216878, %v773_v49  ;;  %v589_v29 = vpop.f32.mrf.mxu1 }
 0x1ae   :  { %v1499_v56 = vsel %vm380_vm0, %v3142_v4, -inf  ;;  %878 = vmatpush.bf16.msrb.mxu3 %v2436_v6  ;;  %788 = vmatpush.bf16.msrb.mxu1 %v2352_v13  ;;  %v2327_v6 = vld [vmem:[#allocation4 + $0x38] sm:$0xf] }
 0x1af   :  { %1500 = vmax.xlane.f32.xlu1 %v1499_v56  ;;  %v1058_v61 = vpack.c.bf16 %v994_v47, %v994_v47  ;;  %v1264_v47 = vpack.c.b16 %v1259_v55, %v1258_v17  ;;  %v2424_v56 = vor.u32 %v2549_v41, %v2423_v16  ;;  %v1377_v2 = vpack.c.b16 %v1372_v36, %v1371_v58  ;;  %v2528_v55 = vld [vmem:[#allocation4 + $0x58] sm:$0xf0] }
 0x1b0   :  { %v585_v17 = vadd.f32 %v3128_v3, %v3068_v52  ;;  %v1054_v21 = vpack.c.bf16 %v990_v26, %v990_v26  ;;  %v2525_v52 = vld [vmem:[#allocation4 + $0x40] sm:$0xf0]  ;;  %v2399_v3 = vld [vmem:[#allocation4 + $0xc8] sm:$0xf]  ;;  %v987_v16 = vmul.f32 0.07216878, %v3081_v11  ;;  %v1369_v36 = vunpack.c.l.b16 %v1053_v39 }
 0x1b1   :  { %v1374_v62 = vunpack.c.l.b16 %v1058_v61  ;;  %v2339_v61 = vld [vmem:[#allocation4 + $0x50] sm:$0xf]  ;;  %v1398_v49 = vsel %vm1099_vm1, %v1377_v2, 0  ;;  %v2328_v58 = vor.u32 %v2525_v52, %v2327_v6  ;;  %v2522_v26 = vld [vmem:[#allocation4 + $0x28] sm:$0xf0] }
 0x1b2   :  { %879 = vmatpush.bf16.msrb.mxu3 %v2424_v56  ;;  %v2340_v14 = vor.u32 %v2528_v55, %v2339_v61  ;;  %v1370_v13 = vunpack.c.l.b16 %v1054_v21  ;;  %v2316_v11 = vor.u32 %v2522_v26, %v2315_v24  ;;  %v2303_v55 = vld [vmem:[#allocation4 + $0x8] sm:$0xf] }
 0x1b3   :  { %v1378_v8 = vpack.c.b16 %v1374_v62, %v1373_v35  ;;  %v583_v35 = vadd.f32 %v3122_v38, %v3060_v23  ;;  %v2412_v62 = vor.u32 %v2546_v42, %v2411_v59  ;;  %v1018_v38 = vpack.c.bf16 %v585_v17, %v585_v17 }
 0x1b4   :  { %v1135_v10 = vpop.f32.mrf.mxu0  ;;  %789 = vmatpush.bf16.msrb.mxu1 %v2340_v14  ;;  %v1376_v2 = vpack.c.b16 %v1370_v13, %v1369_v36  ;;  %v3182_v17 = vadd.s32 56, %v3131_v12  ;;  %v2519_v14 = vld [vmem:[#allocation4 + $0x10] sm:$0xf0] }
 0x1b5   :  { %v3160_v7 = vsel %vm1444_vm3, %v1135_v10, -inf  ;;  %v1401_v57 = vsel %vm1099_vm1, %v1378_v8, 0  ;;  %2495 = vmatmul.msk.bf16.gmra.mxu0 %vm1099_vm1, %v1264_v47  ;;  %v1017_v23 = vpack.c.bf16 %v583_v35, %v583_v35  ;;  %v2400_v8 = vor.u32 %v2543_v51, %v2399_v3  ;;  %v592_v35 = vpop.f32.mrf.mxu1 }
 0x1b6   :  { %v1502_v32 = vsel %vm380_vm0, %v3160_v7, -inf  ;;  %1407 = vmatpush.bf16.xpose.msra.mxu2 %v1401_v57  ;;  %880 = vmatpush.bf16.msrb.mxu3 %v2412_v62  ;;  %v3177_v47 = vadd.s32 24, %v3131_v12  ;;  %v1261_v10 = vunpack.c.l.b16 %v1018_v38  ;;  %v1051_v57 = vpack.c.bf16 %v987_v16, %v987_v16 }
 0x1b7   :  { %1503 = vmax.xlane.f32.xlu1 %v1502_v32  ;;  %v1260_v56 = vunpack.c.l.b16 %v1017_v23  ;;  %v1052_v32 = vpack.c.bf16 %v988_v33, %v988_v33  ;;  %v2304_v39 = vor.u32 %v2519_v14, %v2303_v55  ;;  %vm1450_vm5 = vcmp.le.s32.totalorder %v3133_v30, %v3182_v17 }
 0x1b8   :  { %790 = vmatpush.bf16.msrb.mxu1 %v2328_v58  ;;  %vm1446_vm4 = vcmp.le.s32.totalorder %v3133_v30, %v3177_v47  ;;  %v1367_v21 = vunpack.c.l.b16 %v1051_v57  ;;  %v3198_v62 = vadd.s32 32, %v3131_v12  ;;  %v588_v23 = vadd.f32 %v3149_v60, %v3074_v27 }
 0x1b9   :  { %v1265_v61 = vpack.c.b16 %v1261_v10, %v1260_v56  ;;  %v1368_v59 = vunpack.c.l.b16 %v1052_v32  ;;  %v590_v38 = vadd.f32 %v589_v29, %v3079_v0  ;;  %v3230_v56 = vadd.s32 48, %v3131_v12 }
 0x1ba   :  { %881 = vmatpush.bf16.msrb.mxu3 %v2400_v8  ;;  %vm1447_vm6 = vcmp.le.s32.totalorder %v3133_v30, %v3198_v62  ;;  %v1019_v52 = vpack.c.bf16 %v588_v23, %v588_v23  ;;  %v593_v24 = vadd.f32 %v592_v35, %v3095_v5  ;;  %v3252_v55 = vadd.s32 16, %v3131_v12 }
 0x1bb   :  { %v1375_v6 = vpack.c.b16 %v1368_v59, %v1367_v21  ;;  %v1020_v3 = vpack.c.bf16 %v590_v38, %v590_v38  ;;  %vm1449_vm8 = vcmp.le.s32.totalorder %v3133_v30, %v3230_v56 }
 0x1bc   :  { %v3174_v41 = vpop.f32.mrf.mxu0  ;;  %791 = vmatpush.bf16.msrb.mxu1 %v2316_v11  ;;  %v1347_v0 = vunpack.c.l.b16 %v1019_v52  ;;  %v1021_v32 = vpack.c.bf16 %v593_v24, %v593_v24  ;;  %vm1445_vm9 = vcmp.le.s32.totalorder %v3133_v30, %v3252_v55 }
 0x1bd   :  { %2469 = vmatmul.msk.bf16.vlgmr.msrb.gmra.mxu3 %vm380_vm0, %v2766_v48  ;;  %v594_v58 = vpop.f32.mrf.mxu1  ;;  %v1392_v33 = vsel %vm1099_vm1, %v1375_v6, 0  ;;  %v1348_v60 = vunpack.c.l.b16 %v1020_v3 }
 0x1be   :  { %1408 = vmatpush.bf16.xpose.msra.mxu2 %v1398_v49  ;;  %v1395_v49 = vsel %vm1099_vm1, %v1376_v2, 0 }
 0x1bf   :  { %v1355_v29 = vpack.c.b16 %v1348_v60, %v1347_v0 }
 0x1c0   :  { %792 = vmatpush.bf16.msrb.mxu1 %v2304_v39 }
 0x1c3   :  { %793 = vmatmul.bf16.vlgmr.msrb.gmra.mxu1 %v2770_v9  ;;  %v3215_v9 = vadd.s32 40, %v3131_v12 }
 0x1c4   :  { %v1140_v45 = vpop.f32.mrf.mxu0 }
 0x1c5   :  { %v3191_v42 = vsel %vm1446_vm4, %v1140_v45, -inf  ;;  %2496 = vmatmul.msk.bf16.gmra.mxu0 %vm1099_vm1, %v1265_v61  ;;  %vm1448_vm7 = vcmp.le.s32.totalorder %v3133_v30, %v3215_v9  ;;  %v597_v10 = vpop.f32.mrf.mxu1  ;;  %v1349_v61 = vunpack.c.l.b16 %v1021_v32 }
 0x1c6   :  { %v1508_v48 = vsel %vm380_vm0, %v3191_v42, -inf  ;;  %1409 = vmatpush.bf16.xpose.msra.mxu2 %v1395_v49  ;;  %v3270_v49 = vsel %vm1445_vm9, %v3174_v41, -inf }
 0x1c7   :  { %1509 = vmax.xlane.f32.xlu1 %v1508_v48  ;;  %v598_v48 = vadd.f32 %v597_v10, %v3114_v54  ;;  %v1505_v6 = vsel %vm380_vm0, %v3270_v49, -inf }
 0x1c9   :  { %v1023_v54 = vpack.c.bf16 %v598_v48, %v598_v48 }
 0x1cc   :  { %v1143_v16 = vpop.f32.mrf.mxu0 }
 0x1cd   :  { %v3209_v51 = vsel %vm1447_vm6, %v1143_v16, -inf  ;;  %2470 = vmatmul.msk.bf16.gmra.mxu3 %vm380_vm0, %v2773_v15  ;;  %v595_v15 = vadd.f32 %v594_v58, %v3102_v18  ;;  %v599_v45 = vpop.f32.mrf.mxu1 }
 0x1ce   :  { %v1511_v27 = vsel %vm380_vm0, %v3209_v51, -inf  ;;  %1410 = vmatpush.bf16.xpose.msra.mxu2 %v1392_v33  ;;  %v600_v23 = vadd.f32 %v599_v45, %v3117_v1  ;;  %v1351_v1 = vunpack.c.l.b16 %v1023_v54 }
 0x1cf   :  { %1512 = vmax.xlane.f32.xlu1 %v1511_v27  ;;  %v1022_v2 = vpack.c.bf16 %v595_v15, %v595_v15 }
 0x1d0   :  { %v1024_v3 = vpack.c.bf16 %v600_v23, %v600_v23 }
 0x1d2   :  { %v1352_v16 = vunpack.c.l.b16 %v1024_v3 }
 0x1d3   :  { %798 = vmatmul.bf16.gmra.mxu1 %v2780_v19  ;;  %v1350_v19 = vunpack.c.l.b16 %v1022_v2 }
 0x1d4   :  { %v1145_v36 = vpop.f32.mrf.mxu0  ;;  %v1357_v27 = vpack.c.b16 %v1352_v16, %v1351_v1 }
 0x1d5   :  { %2497 = vmatmul.msk.bf16.vlgmr.msra.gmra.mxu2 %vm1099_vm1, %v1355_v29  ;;  %v3225_v13 = vsel %vm1448_vm7, %v1145_v36, -inf  ;;  %v1356_v59 = vpack.c.b16 %v1350_v19, %v1349_v61  ;;  %v602_v41 = vpop.f32.mrf.mxu1 }
 0x1d6   :  { %v1514_v8 = vsel %vm380_vm0, %v3225_v13, -inf  ;;  %v603_v36 = vadd.f32 %v602_v41, %v3124_v20 }
 0x1d7   :  { %1515 = vmax.xlane.f32.xlu2 %v1514_v8 }
 0x1d8   :  { %v1226_v26 = vpop.f32.mrf.mxu2 }
 0x1d9   :  { %v3237_v11 = vsel %vm1443_vm2, %v1226_v26, -inf }
 0x1da   :  { %v1523_v57 = vsel %vm380_vm0, %v3237_v11, -inf }
 0x1db   :  { %1524 = vmax.xlane.f32.xlu0 %v1523_v57 }
 0x1dc   :  { %v1148_v5 = vpop.f32.mrf.mxu0 }
 0x1dd   :  { %v3247_v18 = vsel %vm1449_vm8, %v1148_v5, -inf  ;;  %2471 = vmatmul.msk.bf16.gmra.mxu3 %vm380_vm0, %v2783_v22  ;;  %v604_v60 = vpop.f32.mrf.mxu1 }
 0x1de   :  { %v1517_v35 = vsel %vm380_vm0, %v3247_v18, -inf  ;;  %v605_v8 = vadd.f32 %v604_v60, %v3126_v44 }
 0x1df   :  { %1518 = vmax.xlane.f32.xlu1 %v1517_v35 }
 0x1e0   :  { %v1228_v14 = vpop.f32.mrf.mxu2  ;;  %v1026_v15 = vpack.c.bf16 %v605_v8, %v605_v8  ;;  %v3940_v8 = vld [vmem:[#allocation9_spill] sm:$0xff] }
 0x1e1   :  { %v3257_v39 = vsel %vm1444_vm3, %v1228_v14, -inf }
 0x1e2   :  { %v1526_v21 = vsel %vm380_vm0, %v3257_v39, -inf  ;;  %v1354_v32 = vunpack.c.l.b16 %v1026_v15 }
 0x1e3   :  { %1527 = vmax.xlane.f32.xlu0 %v1526_v21  ;;  %803 = vmatmul.bf16.gmra.mxu1 %v2790_v25 }
 0x1e4   :  { %v1150_v0 = vpop.f32.mrf.mxu0 }
 0x1e5   :  { %2498 = vmatmul.msk.bf16.gmra.mxu2 %vm1099_vm1, %v1356_v59  ;;  %v3297_v29 = vsel %vm1450_vm5, %v1150_v0, -inf }
 0x1e6   :  { %v1520_v24 = vsel %vm380_vm0, %v3297_v29, -inf }
 0x1e8   :  { %v1231_v38 = vpop.f32.mrf.mxu2 }
 0x1e9   :  { %v3277_v22 = vsel %vm1445_vm9, %v1231_v38, -inf }
 0x1ea   :  { %v1529_v52 = vsel %vm380_vm0, %v3277_v22, -inf }
 0x1eb   :  { %1506 = vmax.xlane.f32.xlu0 %v1505_v6  ;;  %1530 = vmax.xlane.f32.xlu2 %v1529_v52 }
 0x1ed   :  { %2472 = vmatmul.msk.bf16.gmra.mxu3 %vm380_vm0, %v2793_v28  ;;  %v1025_v28 = vpack.c.bf16 %v603_v36, %v603_v36 }
 0x1ef   :  { %v1353_v57 = vunpack.c.l.b16 %v1025_v28 }
 0x1f0   :  { %v1233_v58 = vpop.f32.mrf.mxu2 }
 0x1f1   :  { %v3287_v33 = vsel %vm1446_vm4, %v1233_v58, -inf  ;;  %v1358_v5 = vpack.c.b16 %v1354_v32, %v1353_v57 }
 0x1f2   :  { %v1532_v25 = vsel %vm380_vm0, %v3287_v33, -inf }
 0x1f3   :  { %1533 = vmax.xlane.f32.xlu2 %v1532_v25  ;;  %808 = vmatmul.bf16.gmra.mxu1 %v2800_v31 }
 0x1f5   :  { %2499 = vmatmul.msk.bf16.gmra.mxu2 %vm1099_vm1, %v1357_v27 }
 0x1f8   :  { %v1236_v10 = vpop.f32.mrf.mxu2 }
 0x1f9   :  { %v3307_v26 = vsel %vm1447_vm6, %v1236_v10, -inf }
 0x1fa   :  { %v1535_v44 = vsel %vm380_vm0, %v3307_v26, -inf }
 0x1fb   :  { %1521 = vmax.xlane.f32.xlu2 %v1520_v24 }
 0x1fd   :  { %2473 = vmatmul.msk.bf16.gmra.mxu3 %vm380_vm0, %v2803_v34 }
 0x200   :  { %v1238_v2 = vpop.f32.mrf.mxu2 }
 0x201   :  { %v3312_v20 = vsel %vm1448_vm7, %v1238_v2, -inf }
 0x202   :  { %v1538_v31 = vsel %vm380_vm0, %v3312_v20, -inf }
 0x203   :  { %1539 = vmax.xlane.f32.xlu0 %v1538_v31  ;;  %1536 = vmax.xlane.f32.xlu2 %v1535_v44 }
 0x204   :  { %813 = vmatmul.bf16.gmra.mxu1 %v2810_v37 }
 0x205   :  { %2500 = vmatmul.msk.bf16.gmra.mxu2 %vm1099_vm1, %v1358_v5 }
 0x208   :  { %v1241_v35 = vpop.f32.mrf.mxu2 }
 0x209   :  { %v3324_v61 = vsel %vm1449_vm8, %v1241_v35, -inf  ;;  %v3942_v35 = vld [vmem:[#allocation11_spill] sm:$0xff] }
 0x20a   :  { %v1541_v19 = vsel %vm380_vm0, %v3324_v61, -inf }
 0x20b   :  { %1542 = vmax.xlane.f32.xlu0 %v1541_v19 }
 0x20d   :  { %2474 = vmatmul.msk.bf16.gmra.mxu3 %vm380_vm0, %v2813_v40 }
 0x210   :  { %v1243_v14 = vpop.f32.mrf.mxu2 }
 0x211   :  { %v3332_v45 = vsel %vm1450_vm5, %v1243_v14, -inf }
 0x212   :  { %v1544_v34 = vsel %vm380_vm0, %v3332_v45, -inf  ;;  %v1319_v21 = vpop.f32.mrf.mxu0 }
 0x213   :  { %1545 = vmax.xlane.f32.xlu1 %v1544_v34  ;;  %v3339_v59 = vsel %vm1443_vm2, %v1319_v21, -inf }
 0x214   :  { %v1547_v37 = vsel %vm380_vm0, %v3339_v59, -inf  ;;  %818 = vmatmul.bf16.gmra.mxu1 %v2820_v43 }
 0x215   :  { %1548 = vmax.xlane.f32.xlu0 %v1547_v37 }
 0x21a   :  { %v1321_v48 = vpop.f32.mrf.mxu0 }
 0x21b   :  { %v3349_v23 = vsel %vm1444_vm3, %v1321_v48, -inf }
 0x21c   :  { %v1550_v38 = vsel %vm380_vm0, %v3349_v23, -inf }
 0x21d   :  { %1551 = vmax.xlane.f32.xlu1 %v1550_v38  ;;  %2475 = vmatmul.msk.bf16.gmra.mxu3 %vm380_vm0, %v2823_v46 }
 0x222   :  { %v1501_v6 = vpop.xlane.xlu1 %1500  ;;  %v1324_v52 = vpop.f32.mrf.mxu0 }
 0x223   :  { %v1595_v41 = vsub.f32 %v3142_v4, %v1501_v6  ;;  %v3357_v40 = vsel %vm1445_vm9, %v1324_v52, -inf  ;;  %v3943_v6 = vld [vmem:[#allocation12_spill] sm:$0xff] }
 0x224   :  { %v1553_v43 = vsel %vm380_vm0, %v3357_v40, -inf  ;;  %823 = vmatmul.bf16.gmra.mxu1 %v2830_v50  ;;  %v3939_v50 = vld [vmem:[#allocation8_spill] sm:$0xff] }
 0x225   :  { %v1627_v54 = vmul.f32 1.442695, %v1595_v41  ;;  %1554 = vmax.xlane.f32.xlu2 %v1553_v43 }
 0x227   :  { %2559 = vpow2.f32 %v1627_v54 }
 0x22a   :  { %v1504_v3 = vpop.xlane.xlu1 %1503 }
 0x22b   :  { %v1596_v1 = vsub.f32 %v3160_v7, %v1504_v3 }
 0x22d   :  { %v3365_v4 = vpop.eup %2559  ;;  %v1629_v16 = vmul.f32 1.442695, %v1596_v1  ;;  %2476 = vmatmul.msk.bf16.gmra.mxu3 %vm380_vm0, %v2833_v53 }
 0x22e   :  { %v1691_v58 = vsel %vm380_vm0, %v3365_v4, 0.0 }
 0x22f   :  { %2561 = vpow2.f32 %v1629_v16  ;;  %1692 = vadd.xlane.f32.xlu0 %v1691_v58 }
 0x234   :  { %828 = vmatmul.bf16.gmra.mxu1 %v3939_v50 }
 0x235   :  { %v3371_v46 = vpop.eup %2561 }
 0x236   :  { %v1694_v25 = vsel %vm380_vm0, %v3371_v46, 0.0 }
 0x237   :  { %1695 = vadd.xlane.f32.xlu1 %v1694_v25 }
 0x23a   :  { %v1510_v7 = vpop.xlane.xlu1 %1509 }
 0x23b   :  { %v1598_v27 = vsub.f32 %v3191_v42, %v1510_v7  ;;  %v3941_v42 = vld [vmem:[#allocation10_spill] sm:$0xff] }
 0x23d   :  { %v1633_v0 = vmul.f32 1.442695, %v1598_v27  ;;  %2477 = vmatmul.msk.bf16.gmra.mxu3 %vm380_vm0, %v3940_v8  ;;  %v3945_v8 = vld [vmem:[#allocation14_spill] sm:$0xff] }
 0x23f   :  { %2563 = vpow2.f32 %v1633_v0 }
 0x240   :  { %v794_v28 = vpop.f32.mrf.mxu1  ;;  %v883_v15 = vpop.f32.mrf.mxu3 }
 0x241   :  { %v3384_v57 = vadd.f32 %v883_v15, %v794_v28 }
 0x242   :  { %v1513_v60 = vpop.xlane.xlu1 %1512 }
 0x243   :  { %v1599_v36 = vsub.f32 %v3209_v51, %v1513_v60 }
 0x244   :  { %833 = vmatmul.bf16.gmra.mxu1 %v3941_v42  ;;  %v1326_v42 = vpop.f32.mrf.mxu0 }
 0x245   :  { %v3380_v53 = vpop.eup %2563  ;;  %v1635_v10 = vmul.f32 1.442695, %v1599_v36 }
 0x246   :  { %v1700_v24 = vsel %vm380_vm0, %v3380_v53, 0.0 }
 0x247   :  { %2565 = vpow2.f32 %v1635_v10  ;;  %1701 = vadd.xlane.f32.xlu0 %v1700_v24 }
 0x248   :  { %v796_v31 = vpop.f32.mrf.mxu1  ;;  %v885_v44 = vpop.f32.mrf.mxu3 }
 0x249   :  { %v3391_v5 = vadd.f32 %v885_v44, %v796_v31  ;;  %v3439_v31 = vsel %vm1446_vm4, %v1326_v42, -inf }
 0x24a   :  { %v3395_v19 = vpop.xlane.xlu2 %1515 }
 0x24d   :  { %v3387_v32 = vpop.eup %2565  ;;  %2478 = vmatmul.msk.bf16.gmra.mxu3 %vm380_vm0, %v3942_v35 }
 0x24e   :  { %v1525_v51 = vpop.xlane.xlu0 %1524  ;;  %v1703_v2 = vsel %vm380_vm0, %v3387_v32, 0.0 }
 0x24f   :  { %1704 = vadd.xlane.f32.xlu1 %v1703_v2 }
 0x250   :  { %v3397_v34 = vpop.f32.mrf.mxu1  ;;  %v3400_v37 = vpop.f32.mrf.mxu3 }
 0x252   :  { %v1519_v12 = vpop.xlane.xlu1 %1518 }
 0x254   :  { %838 = vmatmul.bf16.gmra.mxu1 %v3943_v6  ;;  %v1556_v6 = vsel %vm380_vm0, %v3439_v31, -inf }
 0x256   :  { %v1528_v14 = vpop.xlane.xlu0 %1527 }
 0x257   :  { %v1604_v21 = vsub.f32 %v3257_v39, %v1528_v14  ;;  %v1603_v39 = vsub.f32 %v3237_v11, %v1525_v51 }
 0x258   :  { %v1412_v48 = vpop.f32.mrf.mxu2  ;;  %v3405_v3 = vpop.f32.mrf.mxu1 }
 0x259   :  { %v1645_v38 = vmul.f32 1.442695, %v1604_v21  ;;  %v3407_v1 = vpop.f32.mrf.mxu3 }
 0x25b   :  { %2567 = vpow2.f32 %v1645_v38 }
 0x25e   :  { %v1507_v52 = vpop.xlane.xlu0 %1506  ;;  %v1531_v41 = vpop.xlane.xlu2 %1530 }
 0x25f   :  { %v1597_v43 = vsub.f32 %v3270_v49, %v1507_v52  ;;  %v1605_v54 = vsub.f32 %v3277_v22, %v1531_v41  ;;  %v3944_v49 = vld [vmem:[#allocation13_spill] sm:$0xff]  ;;  %v1643_v22 = vmul.f32 1.442695, %v1603_v39 }
 0x260   :  { %v1414_v16 = vpop.f32.mrf.mxu2  ;;  %2479 = vmatmul.msk.bf16.gmra.mxu3 %vm380_vm0, %v3944_v49  ;;  %v804_v60 = vpop.f32.mrf.mxu1 }
 0x261   :  { %v3409_v58 = vpop.eup %2567  ;;  %v1631_v25 = vmul.f32 1.442695, %v1597_v43  ;;  %v1647_v50 = vmul.f32 1.442695, %v1605_v54  ;;  %v3419_v0 = vsel %vm1444_vm3, %v1414_v16, -inf  ;;  %v893_v11 = vpop.f32.mrf.mxu3  ;;  %v3946_v43 = vld [vmem:[#allocation15_spill] sm:$0xff] }
 0x262   :  { %v1718_v7 = vsel %vm380_vm0, %v3409_v58, 0.0  ;;  %v1574_v24 = vsel %vm380_vm0, %v3419_v0, -inf }
 0x263   :  { %2569 = vpow2.f32 %v1631_v25  ;;  %1719 = vadd.xlane.f32.xlu0 %v1718_v7 }
 0x264   :  { %2571 = vpow2.f32 %v1647_v50  ;;  %843 = vmatmul.bf16.gmra.mxu1 %v3945_v8 }
 0x265   :  { %2573 = vpow2.f32 %v1643_v22 }
 0x266   :  { %v1534_v27 = vpop.xlane.xlu2 %1533 }
 0x267   :  { %v1606_v21 = vsub.f32 %v3287_v33, %v1534_v27  ;;  %v3458_v33 = vsel %vm1443_vm2, %v1412_v48, -inf  ;;  %v3947_v27 = vld [vmem:[#allocation16_spill] sm:$0xff] }
 0x268   :  { %v1417_v15 = vpop.f32.mrf.mxu2  ;;  %v806_v44 = vpop.f32.mrf.mxu1  ;;  %v1571_v8 = vsel %vm380_vm0, %v3458_v33, -inf }
 0x269   :  { %v3421_v36 = vpop.eup %2569  ;;  %v895_v35 = vpop.f32.mrf.mxu3  ;;  %v3444_v14 = vsel %vm1445_vm9, %v1417_v15, -inf  ;;  %v1649_v55 = vmul.f32 1.442695, %v1606_v21 }
 0x26a   :  { %v3424_v10 = vpop.eup %2571  ;;  %v1697_v28 = vsel %vm380_vm0, %v3421_v36, 0.0  ;;  %v1577_v52 = vsel %vm380_vm0, %v3444_v14, -inf }
 0x26b   :  { %1575 = vmax.xlane.f32.xlu0 %v1574_v24  ;;  %v1721_v63 = vsel %vm380_vm0, %v3424_v10, 0.0  ;;  %1698 = vadd.xlane.f32.xlu2 %v1697_v28  ;;  %v3434_v2 = vpop.eup %2573  ;;  %2575 = vpow2.f32 %v1649_v55 }
 0x26c   :  { %1722 = vadd.xlane.f32.xlu1 %v1721_v63  ;;  %v1715_v38 = vsel %vm380_vm0, %v3434_v2, 0.0  ;;  %v1600_v63 = vsub.f32 %v3225_v13, %v3395_v19 }
 0x26e   :  { %v3432_v51 = vpop.xlane.xlu2 %1521  ;;  %v1637_v19 = vmul.f32 1.442695, %v1600_v63 }
 0x270   :  { %v1419_v41 = vpop.f32.mrf.mxu2  ;;  %2480 = vmatmul.msk.bf16.gmra.mxu3 %vm380_vm0, %v3946_v43  ;;  %v809_v50 = vpop.f32.mrf.mxu1 }
 0x271   :  { %v898_v7 = vpop.f32.mrf.mxu3 }
 0x272   :  { %v899_v24 = vadd.f32 %v898_v7, %v809_v50 }
 0x273   :  { %1716 = vadd.xlane.f32.xlu2 %v1715_v38  ;;  %1557 = vmax.xlane.f32.xlu0 %v1556_v6  ;;  %v1601_v38 = vsub.f32 %v3247_v18, %v1519_v12  ;;  %v894_v6 = vadd.f32 %v893_v11, %v804_v60  ;;  %v3948_v60 = vld [vmem:[#allocation17_spill] sm:$0xff] }
 0x274   :  { %1578 = vmax.xlane.f32.xlu1 %v1577_v52  ;;  %848 = vmatmul.bf16.gmra.mxu1 %v3947_v27  ;;  %v1889_v28 = vpack.c.bf16 %v899_v24, %v899_v24  ;;  %v896_v52 = vadd.f32 %v895_v35, %v806_v44  ;;  %v889_v44 = vadd.f32 %v3400_v37, %v3397_v34 }
 0x275   :  { %v1639_v11 = vmul.f32 1.442695, %v1601_v38  ;;  %v891_v35 = vadd.f32 %v3407_v1, %v3405_v3  ;;  %v1887_v7 = vpack.c.bf16 %v894_v6, %v894_v6  ;;  %v1602_v3 = vsub.f32 %v3297_v29, %v3432_v51 }
 0x276   :  { %v1540_v54 = vpop.xlane.xlu0 %1539  ;;  %v1537_v16 = vpop.xlane.xlu2 %1536  ;;  %v1885_v1 = vpack.c.bf16 %v889_v44, %v889_v44  ;;  %v1883_v29 = vpack.c.bf16 %v3384_v57, %v3384_v57  ;;  %v1884_v51 = vpack.c.bf16 %v3391_v5, %v3391_v5 }
 0x277   :  { %v1608_v39 = vsub.f32 %v3312_v20, %v1540_v54  ;;  %v1607_v25 = vsub.f32 %v3307_v26, %v1537_v16  ;;  %v3465_v20 = vpop.eup %2575  ;;  %v1329_v16 = vpop.f32.mrf.mxu0  ;;  %v1886_v47 = vpack.c.bf16 %v891_v35, %v891_v35 }
 0x278   :  { %v1422_v48 = vpop.f32.mrf.mxu2  ;;  %v811_v26 = vpop.f32.mrf.mxu1  ;;  %v1724_v54 = vsel %vm380_vm0, %v3465_v20, 0.0  ;;  %v3489_v50 = vsel %vm1447_vm6, %v1329_v16, -inf  ;;  %v1945_v38 = vunpack.c.l.b16 %v1885_v1 }
 0x279   :  { %v1653_v49 = vmul.f32 1.442695, %v1608_v39  ;;  %v1651_v22 = vmul.f32 1.442695, %v1607_v25  ;;  %v900_v15 = vpop.f32.mrf.mxu3  ;;  %v1949_v39 = vunpack.c.l.b16 %v1889_v28  ;;  %v3499_v34 = vsel %vm1447_vm6, %v1422_v48, -inf  ;;  %v3949_v28 = vld [vmem:[#allocation18_spill] sm:$0xff] }
 0x27a   :  { %v901_v42 = vadd.f32 %v900_v15, %v811_v26  ;;  %v1559_v37 = vsel %vm380_vm0, %v3489_v50, -inf  ;;  %v1947_v26 = vunpack.c.l.b16 %v1887_v7  ;;  %v1583_v63 = vsel %vm380_vm0, %v3499_v34, -inf }
 0x27b   :  { %2577 = vpow2.f32 %v1653_v49  ;;  %1572 = vmax.xlane.f32.xlu2 %v1571_v8  ;;  %v1888_v49 = vpack.c.bf16 %v896_v52, %v896_v52  ;;  %v3494_v8 = vsel %vm1446_vm4, %v1419_v41, -inf  ;;  %v1946_v52 = vunpack.c.l.b16 %v1886_v47  ;;  %v3951_v47 = vld [vmem:[#allocation20_spill] sm:$0xff] }
 0x27c   :  { %2579 = vpow2.f32 %v1651_v22  ;;  %v1890_v25 = vpack.c.bf16 %v901_v42, %v901_v42  ;;  %v1580_v15 = vsel %vm380_vm0, %v3494_v8, -inf  ;;  %v1641_v42 = vmul.f32 1.442695, %v1602_v3 }
 0x27d   :  { %2581 = vpow2.f32 %v1637_v19  ;;  %v1948_v62 = vunpack.c.l.b16 %v1888_v49  ;;  %v1944_v19 = vunpack.c.l.b16 %v1884_v51  ;;  %v1952_v44 = vpack.c.b16 %v1946_v52, %v1945_v38 }
 0x27e   :  { %v1950_v18 = vunpack.c.l.b16 %v1890_v25  ;;  %2583 = vpow2.f32 %v1639_v11 }
 0x27f   :  { %v1953_v16 = vpack.c.b16 %v1948_v62, %v1947_v26  ;;  %2585 = vpow2.f32 %v1641_v42  ;;  %v1331_v49 = vpop.f32.mrf.mxu0 }
 0x280   :  { %2481 = vmatmul.msk.bf16.gmra.mxu3 %vm380_vm0, %v3948_v60  ;;  %v1954_v27 = vpack.c.b16 %v1950_v18, %v1949_v39  ;;  %v1424_v41 = vpop.f32.mrf.mxu2 }
 0x281   :  { %v3469_v21 = vpop.eup %2577  ;;  %v814_v24 = vpop.f32.mrf.mxu1  ;;  %v3524_v25 = vsel %vm1448_vm7, %v1424_v41, -inf }
 0x282   :  { %v3472_v43 = vpop.eup %2579  ;;  %v1730_v55 = vsel %vm380_vm0, %v3469_v21, 0.0  ;;  %v903_v12 = vpop.f32.mrf.mxu3  ;;  %1975 = vmatpush.bf16.msrb.mxu0 %v1954_v27  ;;  %v1586_v11 = vsel %vm380_vm0, %v3524_v25, -inf  ;;  %v3950_v27 = vld [vmem:[#allocation19_spill] sm:$0xff] }
 0x283   :  { %1731 = vadd.xlane.f32.xlu1 %v1730_v55  ;;  %1725 = vadd.xlane.f32.xlu2 %v1724_v54  ;;  %v1727_v13 = vsel %vm380_vm0, %v3472_v43, 0.0  ;;  %v3515_v6 = vpop.eup %2581  ;;  %v1543_v54 = vpop.xlane.xlu0 %1542 }
 0x284   :  { %1728 = vadd.xlane.f32.xlu0 %v1727_v13  ;;  %853 = vmatmul.bf16.gmra.mxu1 %v3949_v28  ;;  %v3519_v39 = vpop.eup %2583  ;;  %v1943_v13 = vunpack.c.l.b16 %v1883_v29  ;;  %v1609_v18 = vsub.f32 %v3324_v61, %v1543_v54  ;;  %v1706_v60 = vsel %vm380_vm0, %v3515_v6, 0.0 }
 0x285   :  { %v1709_v35 = vsel %vm380_vm0, %v3519_v39, 0.0 }
 0x286   :  { %v1546_v22 = vpop.xlane.xlu1 %1545  ;;  %1976 = vmatpush.bf16.msrb.mxu0 %v1953_v16  ;;  %v1951_v61 = vpack.c.b16 %v1944_v19, %v1943_v13  ;;  %v3952_v16 = vld [vmem:[#allocation21_spill] sm:$0xff] }
 0x287   :  { %v1610_v48 = vsub.f32 %v3332_v45, %v1546_v22  ;;  %v3517_v45 = vadd.f32 %v903_v12, %v814_v24  ;;  %v1655_v22 = vmul.f32 1.442695, %v1609_v18  ;;  %v3539_v24 = vpop.eup %2585  ;;  %v3544_v12 = vsel %vm1448_vm7, %v1331_v49, -inf  ;;  %v1334_v54 = vpop.f32.mrf.mxu0 }
 0x288   :  { %v1427_v7 = vpop.f32.mrf.mxu2  ;;  %v1712_v28 = vsel %vm380_vm0, %v3539_v24, 0.0  ;;  %v1562_v9 = vsel %vm380_vm0, %v3544_v12, -inf }
 0x289   :  { %v1657_v55 = vmul.f32 1.442695, %v1610_v48  ;;  %v3526_v57 = vpop.f32.mrf.mxu1  ;;  %v3578_v18 = vsel %vm1449_vm8, %v1427_v7, -inf }
 0x28a   :  { %v3528_v5 = vpop.f32.mrf.mxu3  ;;  %1977 = vmatpush.bf16.msrb.mxu0 %v1952_v44  ;;  %v3953_v44 = vld [vmem:[#allocation22_spill] sm:$0xff]  ;;  %v1589_v49 = vsel %vm380_vm0, %v3578_v18, -inf }
 0x28b   :  { %1581 = vmax.xlane.f32.xlu2 %v1580_v15  ;;  %1560 = vmax.xlane.f32.xlu1 %v1559_v37  ;;  %2587 = vpow2.f32 %v1657_v55  ;;  %v3553_v41 = vpop.xlane.xlu0 %1548 }
 0x28c   :  { %1584 = vmax.xlane.f32.xlu0 %v1583_v63  ;;  %2589 = vpow2.f32 %v1655_v22 }
 0x28e   :  { %1978 = vmatpush.bf16.msrb.mxu0 %v1951_v61 }
 0x290   :  { %2482 = vmatmul.msk.bf16.gmra.mxu3 %vm380_vm0, %v3950_v27  ;;  %v1429_v15 = vpop.f32.mrf.mxu2  ;;  %v1552_v62 = vpop.xlane.xlu1 %1551 }
 0x291   :  { %v3546_v37 = vpop.f32.mrf.mxu1  ;;  %v3550_v1 = vpop.eup %2587  ;;  %v3566_v51 = vsel %vm1450_vm5, %v1429_v15, -inf  ;;  %v1612_v38 = vsub.f32 %v3349_v23, %v1552_v62 }
 0x292   :  { %v3548_v3 = vpop.f32.mrf.mxu3  ;;  %v1736_v26 = vsel %vm380_vm0, %v3550_v1, 0.0  ;;  %v3561_v48 = vpop.eup %2589  ;;  %v1592_v55 = vsel %vm380_vm0, %v3566_v51, -inf }
 0x293   :  { %1707 = vadd.xlane.f32.xlu2 %v1706_v60  ;;  %1587 = vmax.xlane.f32.xlu1 %v1586_v11  ;;  %v1733_v52 = vsel %vm380_vm0, %v3561_v48, 0.0  ;;  %v1661_v13 = vmul.f32 1.442695, %v1612_v38  ;;  %v3583_v11 = vsel %vm1449_vm8, %v1334_v54, -inf  ;;  %v3954_v38 = vld [vmem:[#allocation23_spill] sm:$0xff] }
 0x294   :  { %1710 = vadd.xlane.f32.xlu0 %v1709_v35  ;;  %858 = vmatmul.bf16.gmra.mxu1 %v3951_v47  ;;  %v1565_v7 = vsel %vm380_vm0, %v3583_v11, -inf }
 0x298   :  { %v1555_v19 = vpop.xlane.xlu2 %1554 }
 0x299   :  { %v821_v63 = vpop.f32.mrf.mxu1  ;;  %v1613_v22 = vsub.f32 %v3357_v40, %v1555_v19  ;;  %v3955_v19 = vld [vmem:[#allocation24_spill] sm:$0xff] }
 0x29a   :  { %v910_v29 = vpop.f32.mrf.mxu3 }
 0x29b   :  { %1713 = vadd.xlane.f32.xlu1 %v1712_v28  ;;  %1563 = vmax.xlane.f32.xlu2 %v1562_v9  ;;  %v1663_v61 = vmul.f32 1.442695, %v1613_v22 }
 0x29c   :  { %1737 = vadd.xlane.f32.xlu0 %v1736_v26 }
 0x2a0   :  { %2483 = vmatmul.msk.bf16.gmra.mxu3 %vm380_vm0, %v3952_v16 }
 0x2a1   :  { %v824_v23 = vpop.f32.mrf.mxu1 }
 0x2a2   :  { %v1693_v42 = vpop.xlane.xlu0 %1692  ;;  %v913_v60 = vpop.f32.mrf.mxu3 }
 0x2a3   :  { %1734 = vadd.xlane.f32.xlu2 %v1733_v52  ;;  %2591 = vrcp.f32 %v1693_v42 }
 0x2a4   :  { %1593 = vmax.xlane.f32.xlu0 %v1592_v55  ;;  %863 = vmatmul.bf16.gmra.mxu1 %v3953_v44  ;;  %2593 = vpow2.f32 %v1661_v13 }
 0x2a9   :  { %v2592_v27 = vpop.eup %2591  ;;  %v826_v47 = vpop.f32.mrf.mxu1 }
 0x2aa   :  { %v1696_v35 = vpop.xlane.xlu1 %1695  ;;  %v1819_v56 = vmul.f32 %v2592_v27, %v3365_v4  ;;  %v915_v28 = vpop.f32.mrf.mxu3  ;;  %v909_v27 = vadd.f32 %v3548_v3, %v3546_v37  ;;  %v1891_v37 = vpack.c.bf16 %v3517_v45, %v3517_v45 }
 0x2ab   :  { %2595 = vrcp.f32 %v1696_v35  ;;  %1590 = vmax.xlane.f32.xlu2 %v1589_v49  ;;  %v3592_v9 = vpop.eup %2593  ;;  %v914_v35 = vadd.f32 %v913_v60, %v824_v23  ;;  %v916_v49 = vadd.f32 %v915_v28, %v826_v47 }
 0x2ac   :  { %1566 = vmax.xlane.f32.xlu0 %v1565_v7  ;;  %v1851_v15 = vpack.c.bf16 %v1819_v56, %v1819_v56  ;;  %2597 = vpow2.f32 %v1663_v61  ;;  %v1742_v40 = vsel %vm380_vm0, %v3592_v9, 0.0  ;;  %v911_v61 = vadd.f32 %v910_v29, %v821_v63 }
 0x2ae   :  { %v1923_v52 = vunpack.c.l.b16 %v1851_v15  ;;  %v1896_v15 = vpack.c.bf16 %v916_v49, %v916_v49 }
 0x2b0   :  { %2484 = vmatmul.msk.bf16.gmra.mxu3 %vm380_vm0, %v3954_v38  ;;  %v906_v38 = vadd.f32 %v3528_v5, %v3526_v57  ;;  %v2033_v23 = vunpack.c.l.b16 %v1896_v15 }
 0x2b1   :  { %v2596_v26 = vpop.eup %2595  ;;  %v829_v55 = vpop.f32.mrf.mxu1 }
 0x2b2   :  { %v1820_v62 = vmul.f32 %v2596_v26, %v3371_v46  ;;  %v918_v54 = vpop.f32.mrf.mxu3  ;;  %v3599_v16 = vpop.eup %2597  ;;  %v1895_v26 = vpack.c.bf16 %v914_v35, %v914_v35  ;;  %v1892_v3 = vpack.c.bf16 %v906_v38, %v906_v38 }
 0x2b3   :  { %v919_v46 = vadd.f32 %v918_v54, %v829_v55  ;;  %v1745_v44 = vsel %vm380_vm0, %v3599_v16, 0.0  ;;  %v2028_v54 = vunpack.c.l.b16 %v1891_v37 }
 0x2b4   :  { %v1852_v42 = vpack.c.bf16 %v1820_v62, %v1820_v62  ;;  %1743 = vadd.xlane.f32.xlu0 %v1742_v40  ;;  %868 = vmatmul.bf16.gmra.mxu1 %v3955_v19  ;;  %v2032_v55 = vunpack.c.l.b16 %v1895_v26 }
 0x2b5   :  { %v1897_v22 = vpack.c.bf16 %v919_v46, %v919_v46 }
 0x2b6   :  { %v1924_v4 = vunpack.c.l.b16 %v1852_v42  ;;  %v2038_v29 = vpack.c.b16 %v2033_v23, %v2032_v55 }
 0x2b7   :  { %v2034_v40 = vunpack.c.l.b16 %v1897_v22 }
 0x2b8   :  { %v1931_v13 = vpack.c.b16 %v1924_v4, %v1923_v52  ;;  %v1893_v52 = vpack.c.bf16 %v909_v27, %v909_v27  ;;  %v1894_v4 = vpack.c.bf16 %v911_v61, %v911_v61 }
 0x2b9   :  { %v831_v7 = vpop.f32.mrf.mxu1 }
 0x2ba   :  { %2501 = vmatmul.msk.bf16.vlgmr.msrb.gmra.mxu0 %vm380_vm0, %v1931_v13  ;;  %v920_v56 = vpop.f32.mrf.mxu3  ;;  %v2030_v28 = vunpack.c.l.b16 %v1893_v52  ;;  %v2031_v63 = vunpack.c.l.b16 %v1894_v4  ;;  %v2029_v13 = vunpack.c.l.b16 %v1892_v3  ;;  %v1702_v46 = vpop.xlane.xlu0 %1701 }
 0x2bb   :  { %v921_v62 = vadd.f32 %v920_v56, %v831_v7  ;;  %2599 = vrcp.f32 %v1702_v46 }
 0x2bc   :  { %1746 = vadd.xlane.f32.xlu0 %v1745_v44  ;;  %v2037_v19 = vpack.c.b16 %v2031_v63, %v2030_v28  ;;  %v2036_v44 = vpack.c.b16 %v2029_v13, %v2028_v54 }
 0x2bd   :  { %v1898_v42 = vpack.c.bf16 %v921_v62, %v921_v62 }
 0x2bf   :  { %v2035_v60 = vunpack.c.l.b16 %v1898_v42 }
 0x2c1   :  { %v2039_v47 = vpack.c.b16 %v2035_v60, %v2034_v40  ;;  %v834_v57 = vpop.f32.mrf.mxu1  ;;  %v2600_v61 = vpop.eup %2599  ;;  %v1611_v40 = vsub.f32 %v3339_v59, %v3553_v41 }
 0x2c2   :  { %v923_v5 = vpop.f32.mrf.mxu3  ;;  %v1705_v27 = vpop.xlane.xlu1 %1704  ;;  %v1822_v38 = vmul.f32 %v2600_v61, %v3380_v53 }
 0x2c3   :  { %2060 = vmatpush.bf16.msrb.mxu2 %v2039_v47  ;;  %v3611_v35 = vadd.f32 %v923_v5, %v834_v57  ;;  %v1659_v55 = vmul.f32 1.442695, %v1611_v40 }
 0x2c4   :  { %v1854_v23 = vpack.c.bf16 %v1822_v38, %v1822_v38 }
 0x2c6   :  { %v1926_v41 = vunpack.c.l.b16 %v1854_v23 }
 0x2c7   :  { %2061 = vmatpush.bf16.msrb.mxu2 %v2038_v29 }
 0x2c9   :  { %v3613_v22 = vpop.f32.mrf.mxu1 }
 0x2ca   :  { %v3615_v45 = vpop.f32.mrf.mxu3 }
 0x2cb   :  { %2062 = vmatpush.bf16.msrb.mxu2 %v2037_v19 }
 0x2cf   :  { %2063 = vmatpush.bf16.msrb.mxu2 %v2036_v44 }
 0x2d1   :  { %v3618_v15 = vpop.f32.mrf.mxu1 }
 0x2d2   :  { %v3620_v62 = vpop.f32.mrf.mxu3 }
 0x2d6   :  { %v1720_v49 = vpop.xlane.xlu0 %1719 }
 0x2d9   :  { %v3626_v3 = vpop.f32.mrf.mxu1 }
 0x2da   :  { %v3628_v28 = vpop.f32.mrf.mxu3 }
 0x2de   :  { %v1576_v7 = vpop.xlane.xlu0 %1575  ;;  %v1699_v56 = vpop.xlane.xlu2 %1698 }
 0x2df   :  { %v1620_v26 = vsub.f32 %v3419_v0, %v1576_v7  ;;  %2601 = vrcp.f32 %v1699_v56  ;;  %v1723_v52 = vpop.xlane.xlu1 %1722 }
 0x2e0   :  { %2603 = vrcp.f32 %v1720_v49 }
 0x2e1   :  { %v1677_v42 = vmul.f32 1.442695, %v1620_v26  ;;  %v844_v7 = vpop.f32.mrf.mxu1 }
 0x2e3   :  { %2605 = vpow2.f32 %v1677_v42  ;;  %v933_v56 = vpop.f32.mrf.mxu3 }
 0x2e5   :  { %v2602_v4 = vpop.eup %2601 }
 0x2e6   :  { %v1821_v60 = vmul.f32 %v2602_v4, %v3421_v36  ;;  %v1717_v0 = vpop.xlane.xlu2 %1716  ;;  %v2604_v47 = vpop.eup %2603 }
 0x2e7   :  { %2607 = vrcp.f32 %v1717_v0  ;;  %v1828_v53 = vmul.f32 %v2604_v47, %v3409_v58  ;;  %v1579_v46 = vpop.xlane.xlu1 %1578  ;;  %v1558_v44 = vpop.xlane.xlu0 %1557 }
 0x2e8   :  { %v1853_v37 = vpack.c.bf16 %v1821_v60, %v1821_v60  ;;  %2609 = vpow2.f32 %v1659_v55 }
 0x2e9   :  { %v3630_v59 = vpop.eup %2605  ;;  %v1860_v13 = vpack.c.bf16 %v1828_v53, %v1828_v53  ;;  %2611 = vrcp.f32 %v1723_v52  ;;  %v1621_v52 = vsub.f32 %v3444_v14, %v1579_v46 }
 0x2ea   :  { %v1925_v63 = vunpack.c.l.b16 %v1853_v37  ;;  %v1766_v29 = vsel %vm380_vm0, %v3630_v59, 0.0 }
 0x2eb   :  { %1767 = vadd.xlane.f32.xlu2 %v1766_v29  ;;  %v2009_v26 = vunpack.c.l.b16 %v1860_v13  ;;  %v935_v60 = vpop.f32.mrf.mxu3  ;;  %v1679_v53 = vmul.f32 1.442695, %v1621_v52 }
 0x2ec   :  { %v1932_v36 = vpack.c.b16 %v1926_v41, %v1925_v63  ;;  %v1336_v41 = vpop.f32.mrf.mxu0 }
 0x2ed   :  { %v2608_v54 = vpop.eup %2607  ;;  %v3652_v29 = vsel %vm1450_vm5, %v1336_v41, -inf  ;;  %v931_v41 = vadd.f32 %v3628_v28, %v3626_v3 }
 0x2ee   :  { %v1827_v19 = vmul.f32 %v2608_v54, %v3434_v2  ;;  %2502 = vmatmul.msk.bf16.gmra.mxu0 %vm380_vm0, %v1932_v36  ;;  %v1573_v57 = vpop.xlane.xlu2 %1572  ;;  %v3637_v5 = vpop.eup %2609 }
 0x2ef   :  { %v1619_v49 = vsub.f32 %v3458_v33, %v1573_v57  ;;  %v1739_v42 = vsel %vm380_vm0, %v3637_v5, 0.0  ;;  %v2612_v23 = vpop.eup %2611  ;;  %v846_v33 = vpop.f32.mrf.mxu1 }
 0x2f0   :  { %v1859_v58 = vpack.c.bf16 %v1827_v19, %v1827_v19  ;;  %v1829_v37 = vmul.f32 %v2612_v23, %v3424_v10  ;;  %v1614_v10 = vsub.f32 %v3439_v31, %v1558_v44  ;;  %v934_v31 = vadd.f32 %v933_v56, %v844_v7 }
 0x2f1   :  { %v1675_v61 = vmul.f32 1.442695, %v1619_v49  ;;  %v936_v44 = vadd.f32 %v935_v60, %v846_v33 }
 0x2f2   :  { %v2008_v40 = vunpack.c.l.b16 %v1859_v58 }
 0x2f3   :  { %2613 = vpow2.f32 %v1675_v61  ;;  %1740 = vadd.xlane.f32.xlu2 %v1739_v42  ;;  %v938_v49 = vpop.f32.mrf.mxu3  ;;  %v1665_v42 = vmul.f32 1.442695, %v1614_v10 }
 0x2f4   :  { %v2016_v2 = vpack.c.b16 %v2009_v26, %v2008_v40  ;;  %v1568_v26 = vsel %vm380_vm0, %v3652_v29, -inf }
 0x2f6   :  { %v1732_v38 = vpop.xlane.xlu1 %1731  ;;  %v1726_v4 = vpop.xlane.xlu2 %1725  ;;  %2505 = vmatmul.msk.bf16.vlgmr.msrb.gmra.mxu2 %vm380_vm0, %v2016_v2 }
 0x2f7   :  { %v1729_v55 = vpop.xlane.xlu0 %1728  ;;  %2615 = vrcp.f32 %v1726_v4  ;;  %v849_v57 = vpop.f32.mrf.mxu1 }
 0x2f8   :  { %2617 = vrcp.f32 %v1705_v27  ;;  %v1861_v27 = vpack.c.bf16 %v1829_v37, %v1829_v37 }
 0x2f9   :  { %v3643_v0 = vpop.eup %2613  ;;  %2619 = vrcp.f32 %v1732_v38 }
 0x2fa   :  { %v1763_v47 = vsel %vm380_vm0, %v3643_v0, 0.0  ;;  %2621 = vrcp.f32 %v1729_v55  ;;  %v2010_v40 = vunpack.c.l.b16 %v1861_v27 }
 0x2fb   :  { %1764 = vadd.xlane.f32.xlu1 %v1763_v47  ;;  %2623 = vpow2.f32 %v1679_v53  ;;  %v940_v53 = vpop.f32.mrf.mxu3 }
 0x2fd   :  { %v2616_v63 = vpop.eup %2615 }
 0x2fe   :  { %v1582_v36 = vpop.xlane.xlu2 %1581  ;;  %v1561_v54 = vpop.xlane.xlu1 %1560  ;;  %v1830_v14 = vmul.f32 %v2616_v63, %v3465_v20 }
 0x2ff   :  { %v2618_v13 = vpop.eup %2617  ;;  %v1622_v19 = vsub.f32 %v3494_v8, %v1582_v36  ;;  %v1585_v46 = vpop.xlane.xlu0 %1584  ;;  %v939_v8 = vadd.f32 %v938_v49, %v849_v57 }
 0x300   :  { %v1862_v58 = vpack.c.bf16 %v1830_v14, %v1830_v14  ;;  %v1623_v17 = vsub.f32 %v3499_v34, %v1585_v46  ;;  %v1823_v61 = vmul.f32 %v2618_v13, %v3387_v32  ;;  %v2620_v2 = vpop.eup %2619  ;;  %v929_v34 = vadd.f32 %v3620_v62, %v3618_v15 }
 0x301   :  { %v1681_v30 = vmul.f32 1.442695, %v1622_v19  ;;  %v2622_v55 = vpop.eup %2621  ;;  %v1615_v32 = vsub.f32 %v3489_v50, %v1561_v54  ;;  %v1905_v33 = vpack.c.bf16 %v939_v8, %v939_v8  ;;  %v1832_v60 = vmul.f32 %v2620_v2, %v3469_v21  ;;  %v851_v50 = vpop.f32.mrf.mxu1 }
 0x302   :  { %v2011_v20 = vunpack.c.l.b16 %v1862_v58  ;;  %v1683_v38 = vmul.f32 1.442695, %v1623_v17  ;;  %v1855_v23 = vpack.c.bf16 %v1823_v61, %v1823_v61  ;;  %v3664_v37 = vpop.eup %2623  ;;  %v1903_v15 = vpack.c.bf16 %v934_v31, %v934_v31 }
 0x303   :  { %2625 = vpow2.f32 %v1681_v30  ;;  %1569 = vmax.xlane.f32.xlu1 %v1568_v26  ;;  %v1904_v62 = vpack.c.bf16 %v936_v44, %v936_v44  ;;  %v1831_v36 = vmul.f32 %v2622_v55, %v3472_v43  ;;  %v941_v28 = vadd.f32 %v940_v53, %v851_v50 }
 0x304   :  { %v2017_v4 = vpack.c.b16 %v2011_v20, %v2010_v40  ;;  %v1667_v54 = vmul.f32 1.442695, %v1615_v32  ;;  %v1769_v13 = vsel %vm380_vm0, %v3664_v37, 0.0  ;;  %v1901_v27 = vpack.c.bf16 %v929_v34, %v929_v34 }
 0x305   :  { %v2119_v14 = vunpack.c.l.b16 %v1905_v33  ;;  %v1906_v19 = vpack.c.bf16 %v941_v28, %v941_v28  ;;  %v1902_v43 = vpack.c.bf16 %v931_v41, %v931_v41  ;;  %v2117_v46 = vunpack.c.l.b16 %v1903_v15 }
 0x306   :  { %v1708_v52 = vpop.xlane.xlu2 %1707  ;;  %v1588_v47 = vpop.xlane.xlu1 %1587  ;;  %2506 = vmatmul.msk.bf16.gmra.mxu2 %vm380_vm0, %v2017_v4  ;;  %v2118_v10 = vunpack.c.l.b16 %v1904_v62  ;;  %v1927_v49 = vunpack.c.l.b16 %v1855_v23  ;;  %v1864_v58 = vpack.c.bf16 %v1832_v60, %v1832_v60  ;;  %v1899_v17 = vpack.c.bf16 %v3611_v35, %v3611_v35 }
 0x307   :  { %2627 = vrcp.f32 %v1708_v52  ;;  %v1711_v7 = vpop.xlane.xlu0 %1710  ;;  %v1624_v56 = vsub.f32 %v3524_v25, %v1588_v47  ;;  %v926_v25 = vadd.f32 %v3615_v45, %v3613_v22  ;;  %v1863_v22 = vpack.c.bf16 %v1831_v36, %v1831_v36  ;;  %v943_v35 = vpop.f32.mrf.mxu3 }
 0x308   :  { %2629 = vpow2.f32 %v1665_v42  ;;  %v2120_v45 = vunpack.c.l.b16 %v1906_v19  ;;  %v2115_v42 = vunpack.c.l.b16 %v1901_v27  ;;  %v2123_v55 = vpack.c.b16 %v2118_v10, %v2117_v46 }
 0x309   :  { %v3671_v63 = vpop.eup %2625  ;;  %2631 = vpow2.f32 %v1683_v38  ;;  %v1685_v3 = vmul.f32 1.442695, %v1624_v56  ;;  %v1900_v61 = vpack.c.bf16 %v926_v25, %v926_v25  ;;  %v2116_v38 = vunpack.c.l.b16 %v1902_v43  ;;  %v854_v23 = vpop.f32.mrf.mxu1 }
 0x30a   :  { %v1772_v21 = vsel %vm380_vm0, %v3671_v63, 0.0  ;;  %v2124_v2 = vpack.c.b16 %v2120_v45, %v2119_v14  ;;  %v2013_v32 = vunpack.c.l.b16 %v1864_v58  ;;  %v3696_v56 = vadd.f32 %v943_v35, %v854_v23 }
 0x30b   :  { %2633 = vpow2.f32 %v1685_v3  ;;  %1770 = vadd.xlane.f32.xlu1 %v1769_v13  ;;  %1773 = vadd.xlane.f32.xlu2 %v1772_v21  ;;  %v2113_v62 = vunpack.c.l.b16 %v1899_v17  ;;  %v2114_v50 = vunpack.c.l.b16 %v1900_v61  ;;  %v2122_v53 = vpack.c.b16 %v2116_v38, %v2115_v42 }
 0x30c   :  { %2635 = vpow2.f32 %v1667_v54  ;;  %2145 = vmatpush.bf16.msra.mxu0 %v2124_v2 }
 0x30d   :  { %v2628_v57 = vpop.eup %2627  ;;  %v2121_v43 = vpack.c.b16 %v2114_v50, %v2113_v62 }
 0x30e   :  { %v3680_v30 = vpop.eup %2629  ;;  %v1824_v26 = vmul.f32 %v2628_v57, %v3515_v6  ;;  %v1714_v40 = vpop.xlane.xlu1 %1713  ;;  %v2012_v6 = vunpack.c.l.b16 %v1863_v22 }
 0x30f   :  { %v1564_v20 = vpop.xlane.xlu2 %1563  ;;  %v3685_v8 = vpop.eup %2631  ;;  %2637 = vrcp.f32 %v1714_v40  ;;  %v1748_v41 = vsel %vm380_vm0, %v3680_v30, 0.0 }
 0x310   :  { %v1738_v31 = vpop.xlane.xlu0 %1737  ;;  %v1616_v44 = vsub.f32 %v3544_v12, %v1564_v20  ;;  %v1856_v4 = vpack.c.bf16 %v1824_v26, %v1824_v26  ;;  %2639 = vrcp.f32 %v1711_v7  ;;  %v1775_v12 = vsel %vm380_vm0, %v3685_v8, 0.0  ;;  %2146 = vmatpush.bf16.msra.mxu0 %v2123_v55  ;;  %v3706_v14 = vpop.f32.mrf.mxu3 }
 0x311   :  { %v3688_v34 = vpop.eup %2633  ;;  %2641 = vrcp.f32 %v1738_v31  ;;  %v2018_v36 = vpack.c.b16 %v2013_v32, %v2012_v6  ;;  %v3704_v27 = vpop.f32.mrf.mxu1 }
 0x312   :  { %v1669_v52 = vmul.f32 1.442695, %v1616_v44  ;;  %v1928_v47 = vunpack.c.l.b16 %v1856_v4  ;;  %v1778_v7 = vsel %vm380_vm0, %v3688_v34, 0.0  ;;  %v3698_v33 = vpop.eup %2635 }
 0x313   :  { %1749 = vadd.xlane.f32.xlu1 %v1748_v41  ;;  %1776 = vadd.xlane.f32.xlu2 %v1775_v12  ;;  %v1751_v46 = vsel %vm380_vm0, %v3698_v33, 0.0 }
 0x314   :  { %2643 = vpow2.f32 %v1669_v52  ;;  %1779 = vadd.xlane.f32.xlu0 %v1778_v7  ;;  %v1933_v60 = vpack.c.b16 %v1928_v47, %v1927_v49  ;;  %2147 = vmatpush.bf16.msra.mxu0 %v2122_v53 }
 0x315   :  { %v2638_v15 = vpop.eup %2637 }
 0x316   :  { %v2640_v3 = vpop.eup %2639  ;;  %2503 = vmatmul.msk.bf16.gmra.mxu0 %vm380_vm0, %v1933_v60  ;;  %2507 = vmatmul.msk.bf16.gmra.mxu2 %vm380_vm0, %v2018_v36  ;;  %v1826_v13 = vmul.f32 %v2638_v15, %v3539_v24 }
 0x317   :  { %v1735_v28 = vpop.xlane.xlu2 %1734  ;;  %v2642_v25 = vpop.eup %2641  ;;  %v1825_v10 = vmul.f32 %v2640_v3, %v3519_v39 }
 0x318   :  { %2645 = vrcp.f32 %v1735_v28  ;;  %v1594_v54 = vpop.xlane.xlu0 %1593  ;;  %v1834_v57 = vmul.f32 %v2642_v25, %v3550_v1  ;;  %2148 = vmatpush.bf16.msra.mxu0 %v2121_v43  ;;  %v948_v31 = vpop.f32.mrf.mxu3 }
 0x319   :  { %v1626_v21 = vsub.f32 %v3566_v51, %v1594_v54  ;;  %v1858_v51 = vpack.c.bf16 %v1826_v13, %v1826_v13  ;;  %v1857_v22 = vpack.c.bf16 %v1825_v10, %v1825_v10  ;;  %v859_v42 = vpop.f32.mrf.mxu1 }
 0x31a   :  { %v3708_v19 = vpop.eup %2643  ;;  %v1866_v45 = vpack.c.bf16 %v1834_v57, %v1834_v57  ;;  %v949_v13 = vadd.f32 %v948_v31, %v859_v42 }
 0x31b   :  { %v1689_v49 = vmul.f32 1.442695, %v1626_v21  ;;  %v1754_v24 = vsel %vm380_vm0, %v3708_v19, 0.0  ;;  %1752 = vadd.xlane.f32.xlu1 %v1751_v46  ;;  %v1930_v40 = vunpack.c.l.b16 %v1858_v51  ;;  %v1929_v38 = vunpack.c.l.b16 %v1857_v22 }
 0x31c   :  { %1755 = vadd.xlane.f32.xlu2 %v1754_v24  ;;  %v2015_v4 = vunpack.c.l.b16 %v1866_v45  ;;  %v1909_v22 = vpack.c.bf16 %v949_v13, %v949_v13 }
 0x31d   :  { %2647 = vpow2.f32 %v1689_v49 }
 0x31e   :  { %v2646_v58 = vpop.eup %2645 }
 0x31f   :  { %v1833_v17 = vmul.f32 %v2646_v58, %v3561_v48  ;;  %v1591_v61 = vpop.xlane.xlu2 %1590  ;;  %v946_v58 = vadd.f32 %v3706_v14, %v3704_v27 }
 0x320   :  { %v1625_v26 = vsub.f32 %v3578_v18, %v1591_v61  ;;  %v1567_v39 = vpop.xlane.xlu0 %1566  ;;  %v1934_v18 = vpack.c.b16 %v1930_v40, %v1929_v38  ;;  %v950_v32 = vpop.f32.mrf.mxu3  ;;  %v1907_v40 = vpack.c.bf16 %v3696_v56, %v3696_v56 }
 0x321   :  { %v1865_v1 = vpack.c.bf16 %v1833_v17, %v1833_v17  ;;  %v1617_v20 = vsub.f32 %v3583_v11, %v1567_v39  ;;  %v861_v11 = vpop.f32.mrf.mxu1 }
 0x322   :  { %v1687_v44 = vmul.f32 1.442695, %v1625_v26  ;;  %v951_v46 = vadd.f32 %v950_v32, %v861_v11 }
 0x323   :  { %v3719_v2 = vpop.eup %2647  ;;  %v2014_v55 = vunpack.c.l.b16 %v1865_v1  ;;  %v1671_v23 = vmul.f32 1.442695, %v1617_v20  ;;  %v1908_v1 = vpack.c.bf16 %v946_v58, %v946_v58  ;;  %v2200_v20 = vunpack.c.l.b16 %v1909_v22 }
 0x324   :  { %2649 = vpow2.f32 %v1687_v44  ;;  %v1784_v48 = vsel %vm380_vm0, %v3719_v2, 0.0  ;;  %v1910_v45 = vpack.c.bf16 %v951_v46, %v951_v46  ;;  %v2198_v44 = vunpack.c.l.b16 %v1907_v40 }
 0x325   :  { %2651 = vpow2.f32 %v1671_v23  ;;  %1785 = vadd.xlane.f32.xlu1 %v1784_v48  ;;  %v2019_v35 = vpack.c.b16 %v2015_v4, %v2014_v55  ;;  %v2199_v38 = vunpack.c.l.b16 %v1908_v1 }
 0x326   :  { %2504 = vmatmul.msk.bf16.gmra.mxu0 %vm380_vm0, %v1934_v18  ;;  %v2201_v42 = vunpack.c.l.b16 %v1910_v45 }
 0x327   :  { %2508 = vmatmul.msk.bf16.gmra.mxu2 %vm380_vm0, %v2019_v35  ;;  %v2206_v55 = vpack.c.b16 %v2199_v38, %v2198_v44 }
 0x328   :  { %v953_v7 = vpop.f32.mrf.mxu3  ;;  %v2207_v4 = vpack.c.b16 %v2201_v42, %v2200_v20  ;;  %v1744_v27 = vpop.xlane.xlu0 %1743 }
 0x329   :  { %v864_v12 = vpop.f32.mrf.mxu1  ;;  %2653 = vrcp.f32 %v1744_v27 }
 0x32a   :  { %v3725_v6 = vpop.eup %2649  ;;  %v954_v28 = vadd.f32 %v953_v7, %v864_v12 }
 0x32b   :  { %v3727_v52 = vpop.eup %2651  ;;  %v1781_v47 = vsel %vm380_vm0, %v3725_v6, 0.0 }
 0x32c   :  { %1782 = vadd.xlane.f32.xlu0 %v1781_v47  ;;  %v1757_v41 = vsel %vm380_vm0, %v3727_v52, 0.0  ;;  %v1911_v10 = vpack.c.bf16 %v954_v28, %v954_v28 }
 0x32d   :  { %1758 = vadd.xlane.f32.xlu2 %v1757_v41 }
 0x32e   :  { %v2202_v17 = vunpack.c.l.b16 %v1911_v10 }
 0x32f   :  { %v2654_v48 = vpop.eup %2653 }
 0x330   :  { %v955_v62 = vpop.f32.mrf.mxu3  ;;  %v1836_v56 = vmul.f32 %v2654_v48, %v3592_v9 }
 0x331   :  { %v866_v15 = vpop.f32.mrf.mxu1 }
 0x332   :  { %v956_v25 = vadd.f32 %v955_v62, %v866_v15  ;;  %v1868_v11 = vpack.c.bf16 %v1836_v56, %v1836_v56 }
 0x334   :  { %v1912_v57 = vpack.c.bf16 %v956_v25, %v956_v25  ;;  %v2094_v7 = vunpack.c.l.b16 %v1868_v11 }
 0x336   :  { %v2203_v61 = vunpack.c.l.b16 %v1912_v57 }
 0x337   :  { %v1980_v60 = vpop.f32.mrf.mxu0 }
 0x338   :  { %2255 = vst.msk [vmem:[%s3896_s2] sm:$0xff] %vm1099_vm1, %v1980_v60  ;;  %v958_v36 = vpop.f32.mrf.mxu3  ;;  %v2208_v31 = vpack.c.b16 %v2203_v61, %v2202_v17 }
 0x339   :  { %v869_v53 = vpop.f32.mrf.mxu1 }
 0x33a   :  { %v959_v3 = vadd.f32 %v958_v36, %v869_v53 }
 0x33c   :  { %v1913_v54 = vpack.c.bf16 %v959_v3, %v959_v3 }
 0x33e   :  { %v2204_v24 = vunpack.c.l.b16 %v1913_v54 }
 0x33f   :  { %v1982_v50 = vpop.f32.mrf.mxu0 }
 0x340   :  { %2256 = vst.msk [vmem:[%s3896_s2 + $0x8] sm:$0xff] %vm1099_vm1, %v1982_v50  ;;  %v960_v43 = vpop.f32.mrf.mxu3 }
 0x341   :  { %v871_v21 = vpop.f32.mrf.mxu1 }
 0x342   :  { %v961_v49 = vadd.f32 %v960_v43, %v871_v21  ;;  %v1747_v43 = vpop.xlane.xlu0 %1746 }
 0x344   :  { %v1914_v51 = vpack.c.bf16 %v961_v49, %v961_v49 }
 0x346   :  { %v2205_v26 = vunpack.c.l.b16 %v1914_v51 }
 0x348   :  { %v2209_v39 = vpack.c.b16 %v2205_v26, %v2204_v24 }
 0x34a   :  { %2230 = vmatpush.bf16.msra.mxu2 %v2209_v39 }
 0x34e   :  { %2231 = vmatpush.bf16.msra.mxu2 %v2208_v31 }
 0x352   :  { %2232 = vmatpush.bf16.msra.mxu2 %v2207_v4 }
 0x356   :  { %2233 = vmatpush.bf16.msra.mxu2 %v2206_v55 }
 0x35e   :  { %v1768_v14 = vpop.xlane.xlu2 %1767 }
 0x366   :  { %v1741_v23 = vpop.xlane.xlu2 %1740 }
 0x367   :  { %2655 = vrcp.f32 %v1741_v23 }
 0x368   :  { %2657 = vrcp.f32 %v1768_v14 }
 0x36b   :  { %v1985_v18 = vpop.f32.mrf.mxu0 }
 0x36c   :  { %2257 = vst.msk [vmem:[%s3896_s2 + $0x10] sm:$0xff] %vm1099_vm1, %v1985_v18 }
 0x36d   :  { %v2656_v35 = vpop.eup %2655 }
 0x36e   :  { %v1835_v32 = vmul.f32 %v2656_v35, %v3637_v5  ;;  %v1765_v47 = vpop.xlane.xlu1 %1764  ;;  %v2658_v41 = vpop.eup %2657 }
 0x36f   :  { %2659 = vrcp.f32 %v1765_v47  ;;  %v1844_v60 = vmul.f32 %v2658_v41, %v3630_v59 }
 0x370   :  { %v1867_v12 = vpack.c.bf16 %v1835_v32, %v1835_v32 }
 0x371   :  { %v1876_v53 = vpack.c.bf16 %v1844_v60, %v1844_v60 }
 0x372   :  { %v2093_v15 = vunpack.c.l.b16 %v1867_v12 }
 0x373   :  { %v1987_v62 = vpop.f32.mrf.mxu0  ;;  %v2179_v54 = vunpack.c.l.b16 %v1876_v53 }
 0x374   :  { %v2101_v9 = vpack.c.b16 %v2094_v7, %v2093_v15  ;;  %2258 = vst.msk [vmem:[%s3896_s2 + $0x18] sm:$0xff] %vm1099_vm1, %v1987_v62 }
 0x375   :  { %v2660_v50 = vpop.eup %2659 }
 0x376   :  { %v1843_v36 = vmul.f32 %v2660_v50, %v3643_v0  ;;  %v1570_v5 = vpop.xlane.xlu1 %1569  ;;  %2509 = vmatmul.msk.bf16.vlgmr.msra.gmra.mxu0 %vm380_vm0, %v2101_v9 }
 0x377   :  { %v1618_v3 = vsub.f32 %v3652_v29, %v1570_v5 }
 0x378   :  { %v1875_v28 = vpack.c.bf16 %v1843_v36, %v1843_v36 }
 0x379   :  { %v1673_v25 = vmul.f32 1.442695, %v1618_v3  ;;  %v2065_v59 = vpop.f32.mrf.mxu2 }
 0x37a   :  { %v2178_v13 = vunpack.c.l.b16 %v1875_v28  ;;  %2263 = vst.msk [vmem:[%s3896_s2 + $0x40] sm:$0xff] %vm1099_vm1, %v2065_v59 }
 0x37b   :  { %2661 = vpow2.f32 %v1673_v25 }
 0x37c   :  { %v2186_v21 = vpack.c.b16 %v2179_v54, %v2178_v13 }
 0x37e   :  { %v1771_v46 = vpop.xlane.xlu1 %1770  ;;  %2513 = vmatmul.msk.bf16.vlgmr.msra.gmra.mxu2 %vm380_vm0, %v2186_v21  ;;  %v1774_v0 = vpop.xlane.xlu2 %1773 }
 0x37f   :  { %2663 = vrcp.f32 %v1771_v46 }
 0x380   :  { %2665 = vrcp.f32 %v1774_v0 }
 0x381   :  { %v3764_v29 = vpop.eup %2661  ;;  %2667 = vrcp.f32 %v1747_v43  ;;  %v2067_v10 = vpop.f32.mrf.mxu2 }
 0x382   :  { %2264 = vst.msk [vmem:[%s3896_s2 + $0x48] sm:$0xff] %vm1099_vm1, %v2067_v10  ;;  %v1760_v57 = vsel %vm380_vm0, %v3764_v29, 0.0 }
 0x383   :  { %1761 = vadd.xlane.f32.xlu0 %v1760_v57 }
 0x385   :  { %v2664_v49 = vpop.eup %2663 }
 0x386   :  { %v2666_v24 = vpop.eup %2665  ;;  %v1845_v51 = vmul.f32 %v2664_v49, %v3664_v37  ;;  %v1750_v58 = vpop.xlane.xlu1 %1749 }
 0x387   :  { %v1777_v22 = vpop.xlane.xlu2 %1776  ;;  %v2668_v45 = vpop.eup %2667  ;;  %v1846_v17 = vmul.f32 %v2666_v24, %v3671_v63  ;;  %2669 = vrcp.f32 %v1750_v58 }
 0x388   :  { %v1780_v61 = vpop.xlane.xlu0 %1779  ;;  %v1877_v26 = vpack.c.bf16 %v1845_v51, %v1845_v51  ;;  %2671 = vrcp.f32 %v1777_v22  ;;  %v1837_v40 = vmul.f32 %v2668_v45, %v3599_v16 }
 0x389   :  { %v1878_v39 = vpack.c.bf16 %v1846_v17, %v1846_v17  ;;  %2673 = vrcp.f32 %v1780_v61  ;;  %v2070_v20 = vpop.f32.mrf.mxu2 }
 0x38a   :  { %v2180_v1 = vunpack.c.l.b16 %v1877_v26  ;;  %2265 = vst.msk [vmem:[%s3896_s2 + $0x50] sm:$0xff] %vm1099_vm1, %v2070_v20  ;;  %v1869_v63 = vpack.c.bf16 %v1837_v40, %v1837_v40 }
 0x38b   :  { %v2181_v42 = vunpack.c.l.b16 %v1878_v39 }
 0x38c   :  { %v2095_v48 = vunpack.c.l.b16 %v1869_v63 }
 0x38d   :  { %v2670_v37 = vpop.eup %2669  ;;  %v2187_v31 = vpack.c.b16 %v2181_v42, %v2180_v1 }
 0x38e   :  { %v2672_v44 = vpop.eup %2671  ;;  %v1838_v38 = vmul.f32 %v2670_v37, %v3680_v30  ;;  %v1753_v4 = vpop.xlane.xlu1 %1752 }
 0x38f   :  { %v1756_v55 = vpop.xlane.xlu2 %1755  ;;  %v2674_v27 = vpop.eup %2673  ;;  %2675 = vrcp.f32 %v1753_v4  ;;  %2514 = vmatmul.msk.bf16.gmra.mxu2 %vm380_vm0, %v2187_v31  ;;  %v1847_v14 = vmul.f32 %v2672_v44, %v3685_v8 }
 0x390   :  { %v1870_v16 = vpack.c.bf16 %v1838_v38, %v1838_v38  ;;  %2677 = vrcp.f32 %v1756_v55  ;;  %v1848_v23 = vmul.f32 %v2674_v27, %v3688_v34 }
 0x391   :  { %v2072_v18 = vpop.f32.mrf.mxu2  ;;  %v1879_v32 = vpack.c.bf16 %v1847_v14, %v1847_v14 }
 0x392   :  { %v2096_v56 = vunpack.c.l.b16 %v1870_v16  ;;  %2266 = vst.msk [vmem:[%s3896_s2 + $0x58] sm:$0xff] %vm1099_vm1, %v2072_v18  ;;  %v1880_v8 = vpack.c.bf16 %v1848_v23, %v1848_v23 }
 0x393   :  { %v1990_v30 = vpop.f32.mrf.mxu0  ;;  %v2182_v7 = vunpack.c.l.b16 %v1879_v32 }
 0x394   :  { %2259 = vst.msk [vmem:[%s3896_s2 + $0x20] sm:$0xff] %vm1099_vm1, %v1990_v30  ;;  %v2102_v35 = vpack.c.b16 %v2096_v56, %v2095_v48  ;;  %v2183_v60 = vunpack.c.l.b16 %v1880_v8 }
 0x395   :  { %v2676_v11 = vpop.eup %2675 }
 0x396   :  { %v2678_v47 = vpop.eup %2677  ;;  %2510 = vmatmul.msk.bf16.gmra.mxu0 %vm380_vm0, %v2102_v35  ;;  %v1839_v41 = vmul.f32 %v2676_v11, %v3698_v33  ;;  %v2188_v33 = vpack.c.b16 %v2183_v60, %v2182_v7 }
 0x397   :  { %v1840_v12 = vmul.f32 %v2678_v47, %v3708_v19 }
 0x398   :  { %v1786_v34 = vpop.xlane.xlu1 %1785  ;;  %v1871_v9 = vpack.c.bf16 %v1839_v41, %v1839_v41 }
 0x399   :  { %2679 = vrcp.f32 %v1786_v34  ;;  %v2075_v15 = vpop.f32.mrf.mxu2  ;;  %v1872_v50 = vpack.c.bf16 %v1840_v12, %v1840_v12 }
 0x39a   :  { %2267 = vst.msk [vmem:[%s3896_s2 + $0x60] sm:$0xff] %vm1099_vm1, %v2075_v15  ;;  %v2097_v36 = vunpack.c.l.b16 %v1871_v9 }
 0x39b   :  { %v1992_v62 = vpop.f32.mrf.mxu0  ;;  %v2098_v5 = vunpack.c.l.b16 %v1872_v50 }
 0x39c   :  { %2260 = vst.msk [vmem:[%s3896_s2 + $0x28] sm:$0xff] %vm1099_vm1, %v1992_v62 }
 0x39d   :  { %v2103_v59 = vpack.c.b16 %v2098_v5, %v2097_v36 }
 0x39f   :  { %v1783_v53 = vpop.xlane.xlu0 %1782  ;;  %v2680_v19 = vpop.eup %2679  ;;  %2515 = vmatmul.msk.bf16.gmra.mxu2 %vm380_vm0, %v2188_v33 }
 0x3a0   :  { %2681 = vrcp.f32 %v1783_v53  ;;  %v1850_v3 = vmul.f32 %v2680_v19, %v3719_v2  ;;  %v1759_v49 = vpop.xlane.xlu2 %1758 }
 0x3a1   :  { %v2077_v28 = vpop.f32.mrf.mxu2  ;;  %2683 = vrcp.f32 %v1759_v49 }
 0x3a2   :  { %2268 = vst.msk [vmem:[%s3896_s2 + $0x68] sm:$0xff] %vm1099_vm1, %v2077_v28  ;;  %v1882_v13 = vpack.c.bf16 %v1850_v3, %v1850_v3 }
 0x3a3   :  { %v1995_v25 = vpop.f32.mrf.mxu0 }
 0x3a4   :  { %2261 = vst.msk [vmem:[%s3896_s2 + $0x30] sm:$0xff] %vm1099_vm1, %v1995_v25  ;;  %v2185_v43 = vunpack.c.l.b16 %v1882_v13 }
 0x3a6   :  { %v2682_v54 = vpop.eup %2681  ;;  %2511 = vmatmul.msk.bf16.gmra.mxu0 %vm380_vm0, %v2103_v59 }
 0x3a7   :  { %v1849_v21 = vmul.f32 %v2682_v54, %v3725_v6  ;;  %v2684_v58 = vpop.eup %2683 }
 0x3a8   :  { %v1841_v22 = vmul.f32 %v2684_v58, %v3727_v52 }
 0x3a9   :  { %v1881_v2 = vpack.c.bf16 %v1849_v21, %v1849_v21 }
 0x3aa   :  { %v2080_v0 = vpop.f32.mrf.mxu2  ;;  %v1873_v61 = vpack.c.bf16 %v1841_v22, %v1841_v22 }
 0x3ab   :  { %v2184_v46 = vunpack.c.l.b16 %v1881_v2  ;;  %2269 = vst.msk [vmem:[%s3896_s2 + $0x70] sm:$0xff] %vm1099_vm1, %v2080_v0  ;;  %v1997_v10 = vpop.f32.mrf.mxu0 }
 0x3ac   :  { %2262 = vst.msk [vmem:[%s3896_s2 + $0x38] sm:$0xff] %vm1099_vm1, %v1997_v10  ;;  %v2099_v1 = vunpack.c.l.b16 %v1873_v61 }
 0x3ad   :  { %v2189_v57 = vpack.c.b16 %v2185_v43, %v2184_v46 }
 0x3af   :  { %2516 = vmatmul.msk.bf16.gmra.mxu2 %vm380_vm0, %v2189_v57 }
 0x3b2   :  { %v2082_v6 = vpop.f32.mrf.mxu2 }
 0x3b3   :  { %2270 = vst.msk [vmem:[%s3896_s2 + $0x78] sm:$0xff] %vm1099_vm1, %v2082_v6 }
 0x3f3   :  { %v2150_v24 = vpop.f32.mrf.mxu0 }
 0x3f4   :  { %2271 = vst.msk [vmem:[%s3896_s2 + $0x80] sm:$0xff] %vm1099_vm1, %v2150_v24 }
 0x3f6   :  { %v1762_v51 = vpop.xlane.xlu0 %1761 }
 0x3f7   :  { %2685 = vrcp.f32 %v1762_v51 }
 0x3fb   :  { %v2152_v45 = vpop.f32.mrf.mxu0 }
 0x3fc   :  { %2272 = vst.msk [vmem:[%s3896_s2 + $0x88] sm:$0xff] %vm1099_vm1, %v2152_v45 }
 0x3fd   :  { %v2686_v17 = vpop.eup %2685 }
 0x3fe   :  { %v1842_v26 = vmul.f32 %v2686_v17, %v3764_v29 }
 0x400   :  { %v1874_v39 = vpack.c.bf16 %v1842_v26, %v1842_v26 }
 0x401   :  { %v2235_v40 = vpop.f32.mrf.mxu2 }
 0x402   :  { %v2100_v20 = vunpack.c.l.b16 %v1874_v39  ;;  %2279 = vst.msk [vmem:[%s3896_s2 + $0xc0] sm:$0xff] %vm1099_vm1, %v2235_v40 }
 0x404   :  { %v2104_v52 = vpack.c.b16 %v2100_v20, %v2099_v1 }
 0x406   :  { %2512 = vmatmul.msk.bf16.gmra.mxu0 %vm380_vm0, %v2104_v52 }
 0x409   :  { %v2237_v42 = vpop.f32.mrf.mxu2 }
 0x40a   :  { %2280 = vst.msk [vmem:[%s3896_s2 + $0xc8] sm:$0xff] %vm1099_vm1, %v2237_v42 }
 0x412   :  { %v2240_v37 = vpop.f32.mrf.mxu2 }
 0x413   :  { %2281 = vst.msk [vmem:[%s3896_s2 + $0xd0] sm:$0xff] %vm1099_vm1, %v2240_v37  ;;  %v2155_v29 = vpop.f32.mrf.mxu0 }
 0x414   :  { %2273 = vst.msk [vmem:[%s3896_s2 + $0x90] sm:$0xff] %vm1099_vm1, %v2155_v29 }
 0x41a   :  { %v2242_v31 = vpop.f32.mrf.mxu2 }
 0x41b   :  { %2282 = vst.msk [vmem:[%s3896_s2 + $0xd8] sm:$0xff] %vm1099_vm1, %v2242_v31  ;;  %v2157_v44 = vpop.f32.mrf.mxu0 }
 0x41c   :  { %2274 = vst.msk [vmem:[%s3896_s2 + $0x98] sm:$0xff] %vm1099_vm1, %v2157_v44 }
 0x422   :  { %v2245_v63 = vpop.f32.mrf.mxu2 }
 0x423   :  { %2283 = vst.msk [vmem:[%s3896_s2 + $0xe0] sm:$0xff] %vm1099_vm1, %v2245_v63  ;;  %v2160_v38 = vpop.f32.mrf.mxu0 }
 0x424   :  { %2275 = vst.msk [vmem:[%s3896_s2 + $0xa0] sm:$0xff] %vm1099_vm1, %v2160_v38 }
 0x42a   :  { %v2247_v4 = vpop.f32.mrf.mxu2 }
 0x42b   :  { %2284 = vst.msk [vmem:[%s3896_s2 + $0xe8] sm:$0xff] %vm1099_vm1, %v2247_v4  ;;  %v2162_v55 = vpop.f32.mrf.mxu0 }
 0x42c   :  { %2276 = vst.msk [vmem:[%s3896_s2 + $0xa8] sm:$0xff] %vm1099_vm1, %v2162_v55 }
 0x432   :  { %v2250_v27 = vpop.f32.mrf.mxu2 }
 0x433   :  { %2285 = vst.msk [vmem:[%s3896_s2 + $0xf0] sm:$0xff] %vm1099_vm1, %v2250_v27 }
 0x43a   :  { %v2252_v16 = vpop.f32.mrf.mxu2 }
 0x43b   :  { %2286 = vst.msk [vmem:[%s3896_s2 + $0xf8] sm:$0xff] %vm1099_vm1, %v2252_v16 }
 0x483   :  { %v2165_v14 = vpop.f32.mrf.mxu0 }
 0x484   :  { %2277 = vst.msk [vmem:[%s3896_s2 + $0xb0] sm:$0xff] %vm1099_vm1, %v2165_v14 }
 0x48b   :  { %v2167_v23 = vpop.f32.mrf.mxu0 }
 0x48c   :  { %2278 = vst.msk [vmem:[%s3896_s2 + $0xb8] sm:$0xff] %vm1099_vm1, %v2167_v23 }
 0x48d   :  { %2291 = vsyncpa [#allocation3], 1 }
 0x48e   :  { %2292 = vsyncpa [#allocation5], 1 }

</bundles_post_ra>
